<compile_context>
chip_gen: v7x
topology: tpu7x:2x2x1
jax: 0.10.0
libtpu: 0.0.40
codegen_flags: <defaults>
</compile_context>

<pallas_src>
import functools

import jax
import jax.numpy as jnp
from jax.experimental import pallas as pl
from jax.experimental.pallas import tpu as pltpu


def _round_up(v, m):
    return ((v + m - 1) // m) * m


def _sage_kernel(adj_ref, x_src_ref, x_dst_ref, w_self_ref, w_neigh_ref,
                 bias_ref, out_ref, acc_ref, *, deg_col):
    k = pl.program_id(1)
    nk = pl.num_programs(1)

    @pl.when(k == 0)
    def _init():
        acc_ref[...] = jnp.zeros_like(acc_ref)

    # Project the source tile first: adj @ (x @ W_neigh) == (adj @ x) @ W_neigh, and the
    # degree normalization commutes with the projection.
    p = jnp.dot(x_src_ref[...], w_neigh_ref[...],
                preferred_element_type=jnp.float32)                 # [TK, F_PAD]
    # Fold the degree into the same MXU matmul: column `deg_col` of p is all ones, so
    # column `deg_col` of the accumulator becomes the in-degree of each destination row.
    col = jax.lax.broadcasted_iota(jnp.int32, p.shape, 1)
    p = jnp.where(col == deg_col, 1.0, p)

    adj = adj_ref[...].astype(jnp.float32)                          # bf16 0/1 -> f32 (exact)
    acc_ref[...] += jnp.dot(adj, p, preferred_element_type=jnp.float32)

    @pl.when(k == nk - 1)
    def _finalize():
        acc = acc_ref[...]                                          # [TM, F_PAD]
        deg = acc[:, deg_col:deg_col + 1]                           # [TM, 1] full row degree
        inv = pl.reciprocal(jnp.maximum(deg, 1.0), approx=True)     # EUP, not VALU divide
        neigh = jnp.where(deg > 0.0, acc * inv, 0.0)                # isolated nodes -> 0
        # Self path: hoisted out of the K reduction (runs once per row tile).
        self_term = jnp.dot(x_dst_ref[...], w_self_ref[...],
                            preferred_element_type=jnp.float32)
        out_ref[...] = (self_term + neigh + bias_ref[...]).astype(out_ref.dtype)


def sage_forward(adj, x, w_self, w_neigh, bias, *, tm=128, tk=256):
    """adj: [N, N] (dst x src, 0/1), x: [N, F_in], w_*: [F_in, F_out] (pre-transposed),
    bias: [1, F_out]. Returns [N, F_out] float32."""
    n, f_in = x.shape
    f_out = w_self.shape[1]
    tm = min(tm, n)
    tk = min(tk, n)
    assert n % tm == 0 and n % tk == 0, "N must be divisible by the tile sizes"

    # Lane-dense output width + one spare column that carries the row degree.
    f_pad = _round_up(f_out + 1, 128)
    deg_col = f_out
    pad_cols = f_pad - f_out

    w_self_p = jnp.pad(w_self.astype(jnp.float32), ((0, 0), (0, pad_cols)))
    w_neigh_p = jnp.pad(w_neigh.astype(jnp.float32), ((0, 0), (0, pad_cols)))
    bias_p = jnp.pad(bias.astype(jnp.float32).reshape(1, f_out), ((0, 0), (0, pad_cols)))
    adj_bf16 = adj.astype(jnp.bfloat16)   # 0/1 entries are exact in bf16; halves HBM bytes
    x = x.astype(jnp.float32)

    n_row_tiles = n // tm
    n_k_tiles = n // tk

    cost = pl.CostEstimate(
        flops=2 * n * n * f_pad + 2 * n * f_in * f_pad * (n_row_tiles + 1),
        transcendentals=n,
        bytes_accessed=(n * n * 2                      # bf16 adjacency stream (dominant)
                        + (n_row_tiles + 1) * n * f_in * 4
                        + n * f_pad * 4
                        + 2 * f_in * f_pad * 4),
    )

    out_pad = pl.pallas_call(
        functools.partial(_sage_kernel, deg_col=deg_col),
        out_shape=jax.ShapeDtypeStruct((n, f_pad), jnp.float32),
        grid_spec=pltpu.PrefetchScalarGridSpec(
            num_scalar_prefetch=0,
            grid=(n_row_tiles, n_k_tiles),
            in_specs=[
                pl.BlockSpec((tm, tk), lambda i, k: (i, k)),        # adjacency tile (dst, src)
                pl.BlockSpec((tk, f_in), lambda i, k: (k, 0)),      # x rows of source tile
                pl.BlockSpec((tm, f_in), lambda i, k: (i, 0)),      # x rows of dest tile
                pl.BlockSpec((f_in, f_pad), lambda i, k: (0, 0)),   # W_self (padded, resident)
                pl.BlockSpec((f_in, f_pad), lambda i, k: (0, 0)),   # W_neigh (padded, resident)
                pl.BlockSpec((1, f_pad), lambda i, k: (0, 0)),      # bias (padded, resident)
            ],
            out_specs=pl.BlockSpec((tm, f_pad), lambda i, k: (i, 0)),
            scratch_shapes=[pltpu.VMEM((tm, f_pad), jnp.float32)],  # neighbor accumulator
        ),
        compiler_params=pltpu.CompilerParams(
            dimension_semantics=("parallel", "arbitrary"),          # rows parallel (v7x 2 TCs)
            vmem_limit_bytes=64 * 1024 * 1024,
        ),
        cost_estimate=cost,
    )(adj_bf16, x, x, w_self_p, w_neigh_p, bias_p)

    return out_pad[:, :f_out]


def sage_reference(adj, x, w_self, w_neigh, bias):
    deg = jnp.sum(adj, axis=1, keepdims=True)
    agg = adj @ x
    h_neigh = jnp.where(deg > 0, agg / jnp.maximum(deg, 1.0), 0.0)
    return x @ w_self + h_neigh @ w_neigh + bias


if __name__ == "__main__":
    key = jax.random.PRNGKey(0)
    k_adj, k_x, k_ws, k_wn = jax.random.split(key, 4)

    N, IN_SIZE, HID_SIZE, OUT_SIZE = 512, 32, 32, 16  # hid_size unused (single layer)

    # Deterministic random graph (dense adjacency, no self-loops), features, params.
    adj = (jax.random.uniform(k_adj, (N, N)) < 0.05).astype(jnp.float32)
    adj = adj * (1.0 - jnp.eye(N, dtype=jnp.float32))
    x = jax.random.normal(k_x, (N, IN_SIZE), dtype=jnp.float32)

    # PyTorch nn.Linear weights are [out, in]; store transposed [in, out] for the kernel.
    w_self = (jax.random.normal(k_ws, (OUT_SIZE, IN_SIZE), dtype=jnp.float32) * 0.1).T
    w_neigh = (jax.random.normal(k_wn, (OUT_SIZE, IN_SIZE), dtype=jnp.float32) * 0.1).T
    bias = jnp.zeros((1, OUT_SIZE), dtype=jnp.float32)  # DGL SAGEConv bias init = zeros

    out = sage_forward(adj, x, w_self, w_neigh, bias)
    out = jax.block_until_ready(out)

    ref = sage_reference(adj, x, w_self, w_neigh, bias)
    assert out.shape == (N, OUT_SIZE)
    # Slightly loose tolerance: EUP approx reciprocal for the degree normalization.
    max_err = float(jnp.max(jnp.abs(out - ref)))
    assert jnp.allclose(out, ref, atol=1e-2, rtol=1e-2), f"max abs err {max_err}"

    print("KERNEL_OK")
</pallas_src>

<mosaic_0001>
module attributes {stable_mosaic.version = 11 : i64} {
  func.func @_sage_kernel(%arg0: i32, %arg1: i32, %arg2: memref<128x256xbf16, #tpu.memory_space<vmem>>, %arg3: memref<256x32xf32, #tpu.memory_space<vmem>>, %arg4: memref<128x32xf32, #tpu.memory_space<vmem>>, %arg5: memref<32x128xf32, #tpu.memory_space<vmem>>, %arg6: memref<32x128xf32, #tpu.memory_space<vmem>>, %arg7: memref<1x128xf32, #tpu.memory_space<vmem>>, %arg8: memref<128x128xf32, #tpu.memory_space<vmem>>, %arg9: memref<128x128xf32, #tpu.memory_space<vmem>>) attributes {dimension_semantics = [#tpu.dimension_semantics<parallel>, #tpu.dimension_semantics<arbitrary>], iteration_bounds = array<i64: 4, 2>, scalar_prefetch = 0 : i64, scratch_operands = 1 : i64, tpu.core_type = #tpu.core_type<tc>, window_params = [{transform_indices = @transform_0, window_bounds = array<i64: 128, 256>}, {transform_indices = @transform_1, window_bounds = array<i64: 256, 32>}, {transform_indices = @transform_2, window_bounds = array<i64: 128, 32>}, {pipeline_mode = #tpu.pipeline_mode<synchronous>, transform_indices = @transform_3, window_bounds = array<i64: 32, 128>}, {pipeline_mode = #tpu.pipeline_mode<synchronous>, transform_indices = @transform_4, window_bounds = array<i64: 32, 128>}, {pipeline_mode = #tpu.pipeline_mode<synchronous>, transform_indices = @transform_5, window_bounds = array<i64: 1, 128>}, {transform_indices = @transform_6, window_bounds = array<i64: 128, 128>}]} {
    %c0_i32 = arith.constant 0 : i32
    %0 = arith.cmpi eq, %arg1, %c0_i32 : i32
    %1 = arith.extui %0 : i1 to i32
    %c0_i32_0 = arith.constant 0 : i32
    %2 = arith.cmpi ne, %1, %c0_i32_0 : i32
    scf.if %2 {
      %cst_13 = arith.constant 0.000000e+00 : f32
      %20 = vector.broadcast %cst_13 : f32 to vector<128x128xf32>
      %c0_14 = arith.constant 0 : index
      %c0_15 = arith.constant 0 : index
      %21 = vector.load %arg9[%c0_14, %c0_15] : memref<128x128xf32, #tpu.memory_space<vmem>>, vector<128x128xf32>
      tpu.vector_store %arg9[%c0_14, %c0_15], %20 {strides = array<i32>} : memref<128x128xf32, #tpu.memory_space<vmem>>, vector<128x128xf32>,
    } else {
    }
    %c0 = arith.constant 0 : index
    %c0_1 = arith.constant 0 : index
    %3 = vector.load %arg3[%c0, %c0_1] : memref<256x32xf32, #tpu.memory_space<vmem>>, vector<256x32xf32>
    %c0_2 = arith.constant 0 : index
    %c0_3 = arith.constant 0 : index
    %4 = vector.load %arg6[%c0_2, %c0_3] : memref<32x128xf32, #tpu.memory_space<vmem>>, vector<32x128xf32>
    %cst = arith.constant dense<0.000000e+00> : vector<256x128xf32>
    %5 = tpu.matmul %3, %4, %cst {dimension_numbers = #tpu.dot_dimension_numbers<[1], [0], [0], [1], [0, 0, 1, 1], [], []>} : vector<256x32xf32>, vector<32x128xf32>, vector<256x128xf32> -> vector<256x128xf32>
    %6 = tpu.iota {dimensions = array<i32: 1>} : vector<256x128xi32>
    %c16_i32 = arith.constant 16 : i32
    %7 = vector.broadcast %c16_i32 : i32 to vector<256x128xi32>
    %8 = arith.cmpi eq, %6, %7 : vector<256x128xi32>
    %cst_4 = arith.constant 1.000000e+00 : f32
    %9 = vector.broadcast %cst_4 : f32 to vector<256x128xf32>
    %10 = arith.select %8, %9, %5 : vector<256x128xi1>, vector<256x128xf32>
    %c0_5 = arith.constant 0 : index
    %c0_6 = arith.constant 0 : index
    %11 = vector.load %arg2[%c0_5, %c0_6] : memref<128x256xbf16, #tpu.memory_space<vmem>>, vector<128x256xbf16>
    %12 = arith.extf %11 : vector<128x256xbf16> to vector<128x256xf32>
    %c0_7 = arith.constant 0 : index
    %c0_8 = arith.constant 0 : index
    %13 = vector.load %arg9[%c0_7, %c0_8] : memref<128x128xf32, #tpu.memory_space<vmem>>, vector<128x128xf32>
    %cst_9 = arith.constant dense<0.000000e+00> : vector<128x128xf32>
    %14 = tpu.matmul %12, %10, %cst_9 {dimension_numbers = #tpu.dot_dimension_numbers<[1], [0], [0], [1], [0, 0, 1, 1], [], []>} : vector<128x256xf32>, vector<256x128xf32>, vector<128x128xf32> -> vector<128x128xf32>
    %15 = arith.addf %13, %14 : vector<128x128xf32>
    %c0_10 = arith.constant 0 : index
    %c0_11 = arith.constant 0 : index
    %16 = vector.load %arg9[%c0_10, %c0_11] : memref<128x128xf32, #tpu.memory_space<vmem>>, vector<128x128xf32>
    tpu.vector_store %arg9[%c0_10, %c0_11], %15 {strides = array<i32>} : memref<128x128xf32, #tpu.memory_space<vmem>>, vector<128x128xf32>,
    %c1_i32 = arith.constant 1 : i32
    %17 = arith.cmpi eq, %arg1, %c1_i32 : i32
    %18 = arith.extui %17 : i1 to i32
    %c0_i32_12 = arith.constant 0 : i32
    %19 = arith.cmpi ne, %18, %c0_i32_12 : i32
    scf.if %19 {
      %c0_13 = arith.constant 0 : index
      %c0_14 = arith.constant 0 : index
      %20 = vector.load %arg9[%c0_13, %c0_14] : memref<128x128xf32, #tpu.memory_space<vmem>>, vector<128x128xf32>
      %21 = vector.extract_strided_slice %20 {offsets = [0, 16], sizes = [128, 1], strides = [1, 1]} : vector<128x128xf32> to vector<128x1xf32>
      %cst_15 = arith.constant 1.000000e+00 : f32
      %22 = vector.broadcast %cst_15 : f32 to vector<128x1xf32>
      %23 = arith.maximumf %21, %22 : vector<128x1xf32>
      %24 = tpu.reciprocal %23 {approx = true} : vector<128x1xf32> -> vector<128x1xf32>
      %cst_16 = arith.constant 0.000000e+00 : f32
      %25 = vector.broadcast %cst_16 : f32 to vector<128x1xf32>
      %26 = arith.cmpf ogt, %21, %25 : vector<128x1xf32>
      %27 = vector.broadcast %24 : vector<128x1xf32> to vector<128x128xf32>
      %28 = arith.mulf %20, %27 : vector<128x128xf32>
      %cst_17 = arith.constant 0.000000e+00 : f32
      %29 = vector.shape_cast %26 : vector<128x1xi1> to vector<128x1xi1>
      %30 = vector.broadcast %29 : vector<128x1xi1> to vector<128x128xi1>
      %31 = vector.broadcast %cst_17 : f32 to vector<128x128xf32>
      %32 = arith.select %30, %28, %31 : vector<128x128xi1>, vector<128x128xf32>
      %c0_18 = arith.constant 0 : index
      %c0_19 = arith.constant 0 : index
      %33 = vector.load %arg4[%c0_18, %c0_19] : memref<128x32xf32, #tpu.memory_space<vmem>>, vector<128x32xf32>
      %c0_20 = arith.constant 0 : index
      %c0_21 = arith.constant 0 : index
      %34 = vector.load %arg5[%c0_20, %c0_21] : memref<32x128xf32, #tpu.memory_space<vmem>>, vector<32x128xf32>
      %cst_22 = arith.constant dense<0.000000e+00> : vector<128x128xf32>
      %35 = tpu.matmul %33, %34, %cst_22 {dimension_numbers = #tpu.dot_dimension_numbers<[1], [0], [0], [1], [0, 0, 1, 1], [], []>} : vector<128x32xf32>, vector<32x128xf32>, vector<128x128xf32> -> vector<128x128xf32>
      %36 = arith.addf %35, %32 : vector<128x128xf32>
      %c0_23 = arith.constant 0 : index
      %c0_24 = arith.constant 0 : index
      %37 = vector.load %arg7[%c0_23, %c0_24] : memref<1x128xf32, #tpu.memory_space<vmem>>, vector<1x128xf32>
      %38 = vector.broadcast %37 : vector<1x128xf32> to vector<128x128xf32>
      %39 = arith.addf %36, %38 : vector<128x128xf32>
      %c0_25 = arith.constant 0 : index
      %c0_26 = arith.constant 0 : index
      %40 = vector.load %arg8[%c0_25, %c0_26] : memref<128x128xf32, #tpu.memory_space<vmem>>, vector<128x128xf32>
      tpu.vector_store %arg8[%c0_25, %c0_26], %39 {strides = array<i32>} : memref<128x128xf32, #tpu.memory_space<vmem>>, vector<128x128xf32>,
    } else {
    }
    return
  }
  func.func @transform_0(%arg0: i32, %arg1: i32) -> (i32, i32) {
    %c0_i32 = arith.constant 0 : i32
    return %arg0, %arg1 : i32, i32
  }
  func.func @transform_1(%arg0: i32, %arg1: i32) -> (i32, i32) {
    %c0_i32 = arith.constant 0 : i32
    %c0_i32_0 = arith.constant 0 : i32
    return %arg1, %c0_i32 : i32, i32
  }
  func.func @transform_2(%arg0: i32, %arg1: i32) -> (i32, i32) {
    %c0_i32 = arith.constant 0 : i32
    %c0_i32_0 = arith.constant 0 : i32
    return %arg0, %c0_i32 : i32, i32
  }
  func.func @transform_3(%arg0: i32, %arg1: i32) -> (i32, i32) {
    %c0_i32 = arith.constant 0 : i32
    %c0_i32_0 = arith.constant 0 : i32
    %c0_i32_1 = arith.constant 0 : i32
    return %c0_i32, %c0_i32_0 : i32, i32
  }
  func.func @transform_4(%arg0: i32, %arg1: i32) -> (i32, i32) {
    %c0_i32 = arith.constant 0 : i32
    %c0_i32_0 = arith.constant 0 : i32
    %c0_i32_1 = arith.constant 0 : i32
    return %c0_i32, %c0_i32_0 : i32, i32
  }
  func.func @transform_5(%arg0: i32, %arg1: i32) -> (i32, i32) {
    %c0_i32 = arith.constant 0 : i32
    %c0_i32_0 = arith.constant 0 : i32
    %c0_i32_1 = arith.constant 0 : i32
    return %c0_i32, %c0_i32_0 : i32, i32
  }
  func.func @transform_6(%arg0: i32, %arg1: i32) -> (i32, i32) {
    %c0_i32 = arith.constant 0 : i32
    %c0_i32_0 = arith.constant 0 : i32
    return %arg0, %c0_i32 : i32, i32
  }
}

</mosaic_0001>

<bundles_post_ra>
// kernel: tpu_custom_call.1
= control target key start
LH: loop header
LB: loop body
LE: loop exit
PB: predicated region body
PF: predicated region fallthrough
CT: control target
= control target key end

     0   :  { %s3608_s0 = inlined_call_operand.hbm [shape: bf16[512,512], index: 0, kind: input, shape index: {}]   ;;  %s3609_s1 = inlined_call_operand.hbm [shape: f32[512,32], index: 1, kind: input, shape index: {}]   ;;  %s3610_s2 = inlined_call_operand.hbm [shape: f32[512,32], index: 2, kind: input, shape index: {}]   ;;  %s3611_s3 = inlined_call_operand.hbm [shape: f32[32,128], index: 3, kind: input, shape index: {}]   ;;  %s3612_s4 = inlined_call_operand.hbm [shape: f32[32,128], index: 4, kind: input, shape index: {}]   ;;  %s3613_s5 = inlined_call_operand.hbm [shape: f32[1,128], index: 5, kind: input, shape index: {}]   ;;  %s3614_s6 = inlined_call_operand.hbm [shape: f32[512,128], index: 6, kind: output, shape index: {}]  }
   0x1   :  { %3638 = sst [smem:[#allocation31_spill]] %s3608_s0 }
   0x2   :  { %3639 = sst [smem:[#allocation32_spill]] %s3609_s1 }
   0x3   :  { %3640 = sst [smem:[#allocation33_spill]] %s3610_s2 }
   0x4   :  { %3641 = sst [smem:[#allocation34_spill]] %s3611_s3 }
   0x5   :  { %3642 = sst [smem:[#allocation35_spill]] %s3614_s6 }
   0x6   :  { %11 = vsyncpa [#allocation4], 0 }
   0x7   :  { %13 = vsyncpa [#allocation4 + $0x1], 0 }
   0x8   :  { %14 = vsyncpa [#allocation7], 0 }
   0x9   :  { %16 = vsyncpa [#allocation7 + $0x1], 0 }
   0xa   :  { %17 = vsyncpa [#allocation10], 0 }
   0xb   :  { %18 = vsyncpa [#allocation13], 0 }
   0xc   :  { %19 = vsyncpa [#allocation5], 0 }
   0xd   :  { %21 = vsyncpa [#allocation5 + $0x1], 0  ;;  %s2725_s21 = smov 0   ;;  %s2727_s22 = smov 0  }
   0xe   :  { %s2729_s23 = smov 0   ;;  %s2731_s24 = smov 0  }
   0xf   :  { %s2733_s25 = smov 0   ;;  %s2735_s26 = smov 0  }
  0x10   :  { %s2737_s27 = smov 0   ;;  %s2739_s28 = smov 0  }
  0x11   :  { %s2741_s29 = smov 0   ;;  %s2743_s30 = smov 0  }
  0x12   :  { %s2745_s7 = smov 0   ;;  %s2747_s8 = smov 0  }
  0x13   :  { %s2749_s9 = smov 0   ;;  %s2751_s10 = smov 0  }
  0x14 LB: > { %3643 = sst [smem:[#allocation21_spill]] %s2637_s25  ;;  %s2796_s11 = sadd.s32 4294967295, %s2673_s10   ;;  %s2673_s10 = sphi %s2751_s10, %s27_s10   ;;  %s2669_s9 = sphi %s2749_s9, %s3717_s9   ;;  %s2665_s8 = sphi %s2747_s8, %s3716_s8   ;;  %s2661_s7 = sphi %s2745_s7, %s3715_s7   ;;  %s2657_s30 = sphi %s2743_s30, %s3714_s30   ;;  %s2653_s29 = sphi %s2741_s29, %s3713_s29   ;;  %s2649_s28 = sphi %s2739_s28, %s3712_s28   ;;  %s2645_s27 = sphi %s2737_s27, %s3711_s27   ;;  %s2641_s26 = sphi %s2735_s26, %s3705_s26   ;;  %s2637_s25 = sphi %s2733_s25, %s3704_s25   ;;  %s2633_s24 = sphi %s2731_s24, %s3703_s24   ;;  %s2629_s23 = sphi %s2729_s23, %s3710_s23   ;;  %s2625_s22 = sphi %s2727_s22, %s3709_s22   ;;  %s2621_s21 = sphi %s2725_s21, %s3708_s21  }
  0x15   : > { %3644 = sst [smem:[#allocation22_spill]] %s2641_s26  ;;  %p1752_p0 = scmp.ge.s32.totalorder %s2673_s10, 1 }
  0x16   : > { %3645 = sst [smem:[#allocation23_spill]] %s2657_s30  ;;  %p3616_p1 = scmp.eq.s32.totalorder %s2796_s11, 0 }
  0x17   : > { %3646 = sst [smem:[#allocation24_spill]] %s2661_s7  ;;  %p213_p3 = scmp.lt.s32.totalorder %s2673_s10, 9 }
  0x18   : > { %s2675_s13 = smov [#allocation9]   ;;  %s3650_s3 = sld [smem:[#allocation34_spill]] }
  0x19   : > { %p2802_p4 = pnand %p1752_p0, %p213_p3  ;;  %s225_s14 = sshll.u32 %s2675_s13, 4  ;;  %s226_s14 = int_to_ptr.vmem [resolvable:$true] %s225_s14 }
  0x1b   : > { %s3647_s12 = scalar_select %p2802_p4, 1, 0 }
  0x1c   : > { %p2148_p5 = pneg %p2802_p4 }
  0x1d   : > { %3648 = sst [smem:[#allocation25_spill]] %s3647_s12 }
  0x1e   : > { %p2810_p6 = pnand %p2148_p5, %p3616_p1  ;;  %s2337_s18 = scalar_lea.hbm %s3650_s3, 512 }
  0x1f   : > { %p2338_p7 = scmp.ne.s32.totalorder %s3650_s3, %s2337_s18  ;;  %p2344_p11 = scmp.lt.u32.totalorder %s2337_s18, %s3650_s3 }
  0x20   : > { %s3649_s15 = scalar_select %p2810_p6, 1, 0 }
  0x21   : > { %p2822_p8 = pneg %p2810_p6 }
  0x23   : > { %p2340_p9 = pnand %p2822_p8, %p2338_p7 }
  0x25   : > { %p2341_p10 = pneg %p2340_p9 }
  0x27   : > { %p2346_p12 = pnand %p2344_p11, %p2341_p10 }
  0x29   : > { %2349 = shalt.err (!%p2346_p12)
}
  0x2a   : > { %s2350_s16 = scalar_lea.vmem %s226_s14, 512  ;;  %p2358_p5 = scmp.lt.s32.totalorder %s226_s14, %s226_s14 }
  0x2b   : > { %p2351_p13 = scmp.ne.s32.totalorder %s226_s14, %s2350_s16  ;;  %p2359_p2 = scmp.lt.s32.totalorder %s2350_s16, %s2350_s16 }
  0x2d   : > { %p2353_p0 = pnand %p2351_p13, %p2822_p8  ;;  %p2360_p1 = por %p2359_p2, %p2358_p5 }
  0x2f   : > { %p2354_p3 = pneg %p2353_p0 }
  0x31   : > { %p2361_p4 = pnand %p2360_p1, %p2354_p3 }
  0x33   : > { %2364 = shalt.err (!%p2361_p4)
}
  0x34   : > { %s3618_s17 = smov 128   ;;  %s3620_s6 = smov 8  }
  0x35   : > { %2151 = dma.hbm_to_vmem [thread:$0]  (!%p2810_p6), %s3650_s3, 512, %s226_s14, [#allocation10], %s3618_s17, %s3618_s17, %s3620_s6  }
  0x36   : > { %s36_s19 = sadd.s32 1, %s2665_s8  ;;  %s39_s20 = sadd.s32 1, %s2669_s9 }
  0x37   : > { %p37_p1 = scmp.ge.s32.totalorder %s36_s19, 2  ;;  %p3631_p2 = scmp.eq.s32.totalorder %s2673_s10, 0 }
  0x38   : > { %s74_s16 = sadd.s32 1, %s2641_s26  ;;  %p81_p4 = scmp.ne.s32.totalorder %s2641_s26, %s2637_s25 }
  0x39   : > { %s3719_s19 = smov (%p37_p1, %s36_s19), 0  ;;  %s3721_s20 = smov (!%p37_p1, %s39_s20), %s2669_s9 }
  0x3a   : > { %3652 = sst [smem:[#allocation26_spill]] %s3719_s19  ;;  %s44_s30 = ssub.s32 %s2665_s8, %s3719_s19 }
  0x3b   : > { %p2854_p7 = por %p81_p4, %p3631_p2  ;;  %p41_p9 = scmp.ge.s32.totalorder %s3721_s20, 4 }
  0x3c   : > { %p72_p10 = scmp.eq.s32.totalorder %s44_s30, 0  ;;  %p87_p11 = scmp.ne.s32.totalorder %s2637_s25, %s2633_s24 }
  0x3d   : > { %p3630_p12 = scmp.lt.s32.totalorder %s2673_s10, 8  ;;  %s3723_s20 = smov (%p41_p9, %s3721_s20), 0 }
  0x3e   : > { %3654 = sst [smem:[#allocation27_spill]] %s3723_s20  ;;  %s2868_s18 = ssub.s32 %s2669_s9, %s3723_s20 }
  0x3f   : > { %s2864_s7 = scalar_select %p72_p10, %s2641_s26, %s74_s16  }
  0x40   : > { %p3656_p13 = scmp.eq.s32.totalorder %s2796_s11, 0  ;;  %s45_s6 = sor.u32 %s44_s30, %s2868_s18 }
  0x41   : > { %3655 = sst [smem:[#allocation28_spill]] %s2864_s7  ;;  %p2878_p5 = scmp.eq.s32.totalorder %s45_s6, 0 }
  0x42   : > { %p2872_p0 = por %p87_p11, %p3656_p13  ;;  %s287_s3 = sand.u32 1, %s2673_s10  }
  0x43   : > { %s3659_s24 = scalar_select %p2878_p5, 1, 0 }
  0x44   : > { %s3657_s17 = scalar_select %p2872_p0, 1, 0 }
  0x45   : > { %s289_s19 = sand.u32 1, %s2641_s26   ;;  %s1833_s16 = sshll.u32 %s2665_s8, 12 }
  0x46   : > { %3658 = sst [smem:[#allocation29_spill]] %s3657_s17  ;;  %s1762_s25 = sshll.u32 %s289_s19, 8 }
  0x47   : > { %s3660_s1 = sld [smem:[#allocation32_spill]]  ;;  %s291_s2 = scalar_lea.vmem [#allocation6], %s1762_s25 }
  0x48   : > { %s298_s30 = sshll.u32 %s291_s2, 4  ;;  %p2894_p1 = pnand %p3630_p12, %p2854_p7  ;;  %s2898_s30 = int_to_ptr.vmem [resolvable:$true] %s298_s30 }
  0x49   : > { %s2678_s19 = smov [#allocation11]   ;;  %s2902_s7 = scalar_lea.sflag [#allocation7], %s287_s3 }
  0x4a   : > { %s2900_s20 = sshll.u32 %s2678_s19, 4  ;;  %3662 = sst [smem:[#allocation30_spill]] %s2902_s7  ;;  %s239_s20 = int_to_ptr.vmem [resolvable:$true] %s2900_s20 }
  0x4b   : > { %p2367_p9 = pneg %p2894_p1 }
  0x4d   : > { %s2888_s12 = scalar_lea.hbm %s3660_s1, %s1833_s16  ;;  %s2370_s14 = scalar_lea.hbm %s3660_s1, 8192 }
  0x4e   : > { %s2365_s16 = scalar_lea.hbm %s2888_s12, 4096  ;;  %p2371_p11 = scmp.lt.u32.totalorder %s2888_s12, %s3660_s1 }
  0x4f   : > { %p2366_p4 = scmp.ne.s32.totalorder %s2888_s12, %s2365_s16  ;;  %p2372_p13 = scmp.lt.u32.totalorder %s2370_s14, %s2365_s16 }
  0x50   : > { %p2374_p12 = scmp.lt.u32.totalorder %s2365_s16, %s2888_s12 }
  0x51   : > { %p2368_p10 = pnand %p2367_p9, %p2366_p4  ;;  %p2373_p3 = por %p2372_p13, %p2371_p11 }
  0x53   : > { %p2369_p7 = pneg %p2368_p10  ;;  %p2375_p2 = por %p2374_p12, %p2373_p3 }
  0x55   : > { %p2376_p0 = pnand %p2375_p2, %p2369_p7 }
  0x57   : > { %2379 = shalt.err (!%p2376_p0)
}
  0x58   : > { %s2380_s3 = scalar_lea.vmem %s2898_s30, 4096  ;;  %s2679_s19 = smov [#allocation6]  }
  0x59   : > { %p2381_p4 = scmp.ne.s32.totalorder %s2898_s30, %s2380_s3  ;;  %s2385_s2 = sshll.u32 %s2679_s19, 4  ;;  %s2386_s2 = int_to_ptr.vmem [resolvable:$false] %s2385_s2 }
  0x5a   : > { %s2387_s26 = scalar_lea.vmem %s2386_s2, 8192  ;;  %p2388_p6 = scmp.lt.s32.totalorder %s2898_s30, %s2386_s2 }
  0x5b   : > { %p2383_p10 = pnand %p2381_p4, %p2367_p9  ;;  %p2389_p11 = scmp.lt.s32.totalorder %s2387_s26, %s2380_s3 }
  0x5d   : > { %p2384_p5 = pneg %p2383_p10  ;;  %p2390_p13 = por %p2389_p11, %p2388_p6 }
  0x5f   : > { %p2391_p12 = pnand %p2390_p13, %p2384_p5 }
  0x61   : > { %2394 = shalt.err (!%p2391_p12)
}
  0x62   : > { %s3663_s17 = smov 8   ;;  %s3664_s16 = smov 128  }
  0x63   : > { %2164 = dma.hbm_to_vmem [thread:$0]  (!%p2894_p1), %s2888_s12, 4096, %s2898_s30, %s2902_s7, %s3664_s16, %s3664_s16, %s3663_s17  }
  0x64   : > { %s2395_s19 = scalar_lea.hbm %s3612_s4, 512 }
  0x65   : > { %p2396_p6 = scmp.ne.s32.totalorder %s3612_s4, %s2395_s19  ;;  %p2402_p3 = scmp.lt.u32.totalorder %s2395_s19, %s3612_s4 }
  0x67   : > { %p2398_p2 = pnand %p2396_p6, %p2822_p8 }
  0x69   : > { %p2399_p0 = pneg %p2398_p2 }
  0x6b   : > { %p2404_p5 = pnand %p2402_p3, %p2399_p0 }
  0x6d   : > { %2407 = shalt.err (!%p2404_p5)
}
  0x6e   : > { %s2408_s1 = scalar_lea.vmem %s239_s20, 512  ;;  %p2416_p4 = scmp.lt.s32.totalorder %s239_s20, %s239_s20 }
  0x6f   : > { %p2409_p1 = scmp.ne.s32.totalorder %s239_s20, %s2408_s1  ;;  %p2417_p10 = scmp.lt.s32.totalorder %s2408_s1, %s2408_s1 }
  0x71   : > { %p2411_p9 = pnand %p2409_p1, %p2822_p8  ;;  %p2418_p11 = por %p2417_p10, %p2416_p4 }
  0x73   : > { %p2412_p7 = pneg %p2411_p9 }
  0x75   : > { %p2419_p13 = pnand %p2418_p11, %p2412_p7 }
  0x77   : > { %2422 = shalt.err (!%p2419_p13)
}
  0x78   : > { %p3665_p12 = scmp.ne.s32.totalorder %s3649_s15, 0  ;;  %s2680_s25 = smov [#allocation12]  }
  0x79   : > { %s252_s14 = sshll.u32 %s2680_s25, 4  ;;  %s2423_s1 = scalar_lea.hbm %s3613_s5, 16  ;;  %s253_s14 = int_to_ptr.vmem [resolvable:$true] %s252_s14 }
  0x7a   : > { %2154 = dma.hbm_to_vmem [thread:$0]  (!%p3665_p12), %s3612_s4, 512, %s239_s20, [#allocation10], %s3664_s16, %s3664_s16, %s3663_s17  }
  0x7b   : > { %p2424_p6 = scmp.ne.s32.totalorder %s3613_s5, %s2423_s1  ;;  %p2430_p3 = scmp.lt.u32.totalorder %s2423_s1, %s3613_s5 }
  0x7d   : > { %p2426_p2 = pnand %p2424_p6, %p2822_p8 }
  0x7f   : > { %p2427_p0 = pneg %p2426_p2 }
  0x81   : > { %p2432_p5 = pnand %p2430_p3, %p2427_p0 }
  0x83   : > { %2435 = shalt.err (!%p2432_p5)
}
  0x84   : > { %s2436_s20 = scalar_lea.vmem %s253_s14, 16  ;;  %s2443_s12 = scalar_lea.vmem %s253_s14, 32 }
  0x85   : > { %p2437_p1 = scmp.ne.s32.totalorder %s253_s14, %s2436_s20  ;;  %p2444_p4 = scmp.lt.s32.totalorder %s253_s14, %s253_s14 }
  0x86   : > { %p2445_p10 = scmp.lt.s32.totalorder %s2443_s12, %s2436_s20 }
  0x87   : > { %p2439_p9 = pnand %p2437_p1, %p2822_p8 }
  0x88   : > { %p2446_p11 = por %p2445_p10, %p2444_p4 }
  0x89   : > { %p2440_p7 = pneg %p2439_p9 }
  0x8b   : > { %p2447_p13 = pnand %p2446_p11, %p2440_p7 }
  0x8d   : > { %2450 = shalt.err (!%p2447_p13)
}
  0x8e   : > { %2157 = dma.hbm_to_vmem [thread:$0]  (!%p3665_p12), %s3613_s5, 16, %s253_s14, [#allocation13]  }
  0x8f   : > { %s48_s13 = sadd.s32 1, %s2653_s29  ;;  %p55_p8 = scmp.ne.s32.totalorder %s2653_s29, %s2649_s28 }
  0x90   : > { %p3666_p6 = scmp.ne.s32.totalorder %s3659_s24, 0  ;;  %p3667_p2 = scmp.eq.s32.totalorder %s2673_s10, 0 }
  0x91   : > { %p61_p3 = scmp.ne.s32.totalorder %s2649_s28, %s2645_s27  ;;  %s263_s19 = sand.u32 1, %s2653_s29  }
  0x92   : > { %s2979_s15 = scalar_select %p3666_p6, %s2653_s29, %s48_s13  }
  0x93   : > { %p2983_p0 = por %p3667_p2, %p55_p8  ;;  %s1759_s3 = sshll.u32 %s2665_s8, 1 }
  0x94   : > { %p3669_p5 = scmp.eq.s32.totalorder %s2796_s11, 0  ;;  %s1757_s14 = sshll.u32 %s263_s19, 7 }
  0x95   : > { %s1832_s2 = sshll.u32 %s2669_s9, 6  ;;  %s267_s26 = scalar_lea.vmem [#allocation3], %s1757_s14 }
  0x96   : > { %p2993_p1 = por %p3669_p5, %p61_p3  ;;  %s274_s6 = sadd.s32 %s1832_s2, %s1759_s3 }
  0x97   : > { %s1761_s24 = sshll.u32 %s274_s6, 6  ;;  %s277_s20 = sshll.u32 %s267_s26, 4  ;;  %s3003_s20 = int_to_ptr.vmem [resolvable:$true] %s277_s20 }
  0x98   : > { %s3671_s0 = sld [smem:[#allocation31_spill]]  ;;  %p3672_p12 = scmp.lt.s32.totalorder %s2673_s10, 8 }
  0x99   : > { %s3013_s13 = scalar_lea.sflag [#allocation4], %s263_s19 }
  0x9a   : > { %p3009_p9 = pnand %p3672_p12, %p2983_p0 }
  0x9c   : > { %p2453_p4 = pneg %p3009_p9 }
  0x9e   : > { %s3001_s25 = scalar_lea.hbm %s3671_s0, %s1761_s24  ;;  %s2456_s7 = scalar_lea.hbm %s3671_s0, 16384 }
  0x9f   : > { %s2451_s3 = scalar_lea.hbm %s3001_s25, 2048  ;;  %p2457_p13 = scmp.lt.u32.totalorder %s3001_s25, %s3671_s0 }
  0xa0   : > { %p2452_p7 = scmp.ne.s32.totalorder %s3001_s25, %s2451_s3  ;;  %p2458_p8 = scmp.lt.u32.totalorder %s2456_s7, %s2451_s3 }
  0xa1   : > { %p2460_p2 = scmp.lt.u32.totalorder %s2451_s3, %s3001_s25 }
  0xa2   : > { %p2454_p10 = pnand %p2453_p4, %p2452_p7  ;;  %p2459_p6 = por %p2458_p8, %p2457_p13 }
  0xa4   : > { %p2455_p11 = pneg %p2454_p10  ;;  %p2461_p0 = por %p2460_p2, %p2459_p6 }
  0xa6   : > { %p2462_p3 = pnand %p2461_p0, %p2455_p11 }
  0xa8   : > { %2465 = shalt.err (!%p2462_p3)
}
  0xa9   : > { %s2466_s19 = scalar_lea.vmem %s3003_s20, 2048  ;;  %s2681_s26 = smov [#allocation3]  }
  0xaa   : > { %p2467_p5 = scmp.ne.s32.totalorder %s3003_s20, %s2466_s19  ;;  %s2471_s12 = sshll.u32 %s2681_s26, 4  ;;  %s2472_s12 = int_to_ptr.vmem [resolvable:$false] %s2471_s12 }
  0xab   : > { %s2473_s30 = scalar_lea.vmem %s2472_s12, 4096  ;;  %p2474_p10 = scmp.lt.s32.totalorder %s3003_s20, %s2472_s12 }
  0xac   : > { %p2469_p12 = pnand %p2467_p5, %p2453_p4  ;;  %p2475_p13 = scmp.lt.s32.totalorder %s2473_s30, %s2466_s19 }
  0xae   : > { %p2470_p7 = pneg %p2469_p12  ;;  %p2476_p8 = por %p2475_p13, %p2474_p10 }
  0xb0   : > { %p2477_p6 = pnand %p2476_p8, %p2470_p7 }
  0xb2   : > { %2480 = shalt.err (!%p2477_p6)
}
  0xb3   : > { %s2682_s3 = smov 256   ;;  %s1751_s27 = sadd.s32 4294967294, %s2673_s10  }
  0xb4   : > { %2161 = dma.hbm_to_vmem [thread:$0]  (!%p3009_p9), %s3001_s25, 2048, %s3003_s20, %s3013_s13, %s2682_s3, %s3664_s16, %s3663_s17  }
  0xb5   : > { %s100_s14 = sadd.s32 1, %s2629_s23  ;;  %p107_p4 = scmp.ne.s32.totalorder %s2629_s23, %s2625_s22 }
  0xb6   : > { %p3674_p11 = scmp.eq.s32.totalorder %s2868_s18, 0  ;;  %p3675_p2 = scmp.eq.s32.totalorder %s2673_s10, 0 }
  0xb7   : > { %p113_p3 = scmp.ne.s32.totalorder %s2625_s22, %s2621_s21  ;;  %p3677_p5 = scmp.eq.s32.totalorder %s2796_s11, 7 }
  0xb8   : > { %s3050_s2 = scalar_select %p3674_p11, %s2629_s23, %s100_s14  }
  0xb9   : > { %p3054_p0 = por %p107_p4, %p3675_p2  ;;  %p3062_p12 = por %p3677_p5, %p107_p4 }
  0xba   : > { %p206_p9 = scmp.eq.s32.totalorder %s1751_s27, 7  ;;  %p3679_p7 = scmp.eq.s32.totalorder %s2796_s11, 0 }
  0xbb   : > { %s3678_s6 = scalar_select %p3062_p12, 1, 0 }
  0xbc   : > { %p3068_p10 = por %p113_p3, %p3679_p7  ;;  %s310_s18 = sand.u32 1, %s2629_s23  }
  0xbd   : > { %p3073_p13 = por %p206_p9, %p113_p3  ;;  %s1765_s13 = sshll.u32 %s310_s18, 7 }
  0xbe   : > { %s3680_s20 = scalar_select %p3068_p10, 1, 0 }
  0xbf   : > { %s3681_s25 = scalar_select %p3073_p13, 1, 0 }
  0xc0   : > { %s1834_s24 = sshll.u32 %s2669_s9, 11  ;;  %s3682_s12 = sld [smem:[#allocation33_spill]] }
  0xc1   : > { %s312_s3 = scalar_lea.vmem [#allocation8], %s1765_s13  ;;  %p3683_p8 = scmp.lt.s32.totalorder %s2673_s10, 8 }
  0xc2   : > { %s319_s27 = sshll.u32 %s312_s3, 4  ;;  %s3083_s27 = int_to_ptr.vmem [resolvable:$true] %s319_s27 }
  0xc3   : > { %p3089_p6 = pnand %p3683_p8, %p3054_p0 }
  0xc5   : > { %p2483_p11 = pneg %p3089_p6 }
  0xc6   : > { %s3081_s30 = scalar_lea.hbm %s3682_s12, %s1834_s24  ;;  %s2486_s19 = scalar_lea.hbm %s3682_s12, 8192 }
  0xc7   : > { %s2481_s18 = scalar_lea.hbm %s3081_s30, 2048  ;;  %p2487_p0 = scmp.lt.u32.totalorder %s3081_s30, %s3682_s12 }
  0xc8   : > { %p2482_p4 = scmp.ne.s32.totalorder %s3081_s30, %s2481_s18  ;;  %p2488_p5 = scmp.lt.u32.totalorder %s2486_s19, %s2481_s18 }
  0xc9   : > { %p2490_p7 = scmp.lt.u32.totalorder %s2481_s18, %s3081_s30 }
  0xca   : > { %p2484_p2 = pnand %p2483_p11, %p2482_p4  ;;  %p2489_p9 = por %p2488_p5, %p2487_p0 }
  0xcc   : > { %p2485_p3 = pneg %p2484_p2  ;;  %p2491_p8 = por %p2490_p7, %p2489_p9 }
  0xce   : > { %p2492_p13 = pnand %p2491_p8, %p2485_p3 }
  0xd0   : > { %2495 = shalt.err (!%p2492_p13)
}
  0xd1   : > { %s2496_s3 = scalar_lea.vmem %s3083_s27, 2048  ;;  %s2683_s13 = smov [#allocation8]  }
  0xd2   : > { %p2497_p4 = scmp.ne.s32.totalorder %s3083_s27, %s2496_s3  ;;  %s2501_s24 = sshll.u32 %s2683_s13, 4  ;;  %s2502_s24 = int_to_ptr.vmem [resolvable:$false] %s2501_s24 }
  0xd3   : > { %s2503_s7 = scalar_lea.vmem %s2502_s24, 4096  ;;  %p2504_p10 = scmp.lt.s32.totalorder %s3083_s27, %s2502_s24 }
  0xd4   : > { %p2499_p2 = pnand %p2497_p4, %p2483_p11  ;;  %p2505_p0 = scmp.lt.s32.totalorder %s2503_s7, %s2496_s3 }
  0xd6   : > { %p2500_p12 = pneg %p2499_p2  ;;  %p2506_p5 = por %p2505_p0, %p2504_p10 }
  0xd8   : > { %p2507_p9 = pnand %p2506_p5, %p2500_p12 }
  0xda   : > { %2510 = shalt.err (!%p2507_p9)
}
  0xdb   : > { %s3685_s18 = sld [smem:[#allocation30_spill]]  ;;  %s3686_s19 = sld [smem:[#allocation25_spill]] }
  0xe1   : > { %2167 = dma.hbm_to_vmem [thread:$0]  (!%p3089_p6), %s3081_s30, 2048, %s3083_s27, %s3685_s18, %s3664_s16, %s3664_s16, %s3663_s17  }
  0xe2   : > { %p3687_p13 = scmp.ne.s32.totalorder %s3686_s19, 0 }
  0xe3   : > { %s333_s26 = sand.u32 (!%p3687_p13), 1, %s2649_s28  }
  0xe4   : > { %331 = sbr.rel (%p3687_p13) target bundleno = 1064 (0x428), region = 44  ;;  %s1769_s13 = sshll.u32 (!%p3687_p13), %s333_s26, 7 }
  0xe5   : > { %s334_s3 = scalar_lea.sflag (!%p3687_p13), [#allocation4], %s333_s26  ;;  %s3125_s24 = scalar_lea.vmem (!%p3687_p13), [#allocation3], %s1769_s13 }
  0xeb   : > { %2596 = dma.done.wait (%p2993_p1), %s334_s3, 2048  }
  0xec   : > { %2598 = vsyncadd (%p2993_p1), %s334_s3, 4294965248  ;;  %s3688_s14 = sld [smem:[#allocation21_spill]]  ;;  %s342_s0 = sand.u32 1, %s2796_s11  }
  0xed   : > { %s3689_s7 = sld [smem:[#allocation29_spill]]  ;;  %s343_s30 = scalar_lea.sflag [#allocation7], %s342_s0 }
  0xf2   : > { %s344_s17 = sand.u32 1, %s3688_s14  }
  0xf3   : > { %s1770_s16 = sshll.u32 %s344_s17, 8  ;;  %p3690_p12 = scmp.ne.s32.totalorder %s3689_s7, 0 }
  0xf4   : > { %s3133_s27 = scalar_lea.vmem [#allocation6], %s1770_s16 }
  0xf5   : > { %2600 = dma.done.wait (%p3690_p12), %s343_s30, 4096  }
  0xf6   : > { %2602 = vsyncadd (%p3690_p12), %s343_s30, 4294963200  ;;  %s353_s18 = sand.u32 1, %s2625_s22   ;;  %p3691_p1 = scmp.ne.s32.totalorder %s3680_s20, 0 }
  0xf7   : > { %s1771_s1 = sshll.u32 %s353_s18, 7 }
  0xf8   : > { %s3142_s19 = scalar_lea.vmem [#allocation8], %s1771_s1 }
  0xf9   : > { %2604 = dma.done.wait (%p3691_p1), %s343_s30, 2048  }
  0xfa   : > { %2606 = vsyncadd (%p3691_p1), %s343_s30, 4294965248  ;;  %p3692_p10 = scmp.eq.s32.totalorder %s2796_s11, 0 }
  0xfc   : > { %2608 = dma.done.wait (%p3692_p10), [#allocation10], 1024   ;;  %p3693_p6 = pmov %p3692_p10 }
  0xfe   : > { %2610 = vsyncadd (%p3693_p6), [#allocation10], 4294966272  ;;  %p3694_p11 = pmov %p3693_p6 }
  0xff   : > { %p3695_p3 = pmov %p3693_p6 }
 0x100   : > { %2612 = dma.done.wait (%p3694_p11), [#allocation13], 16  }
 0x101   : > { %2614 = vsyncadd (%p3695_p3), [#allocation13], 4294967280  ;;  %s3156_s0 = scalar_lea.vmem [#allocation14], %s1771_s1  ;;  %s3696_s26 = sld [smem:[#allocation23_spill]] }
 0x107   : > { %p1776_p7 = scmp.ne.s32.totalorder %s3696_s26, 0 }
 0x108   : > { %v2684_v0 = vmov (!%p1776_p7), 0.0  }
 0x109   : > { %414 = sbr.rel (%p1776_p7) target bundleno = 273 (0x111), region = 72  ;;  %415 = vst [vmem:[#allocation2] sm:$0xff] (!%p1776_p7), %v2684_v0  ;;  %416 = vst [vmem:[#allocation2 + $0x8] sm:$0xff] (!%p1776_p7), %v2684_v0 }
 0x10a   : > { %417 = vst [vmem:[#allocation2 + $0x10] sm:$0xff] (!%p1776_p7), %v2684_v0  ;;  %418 = vst [vmem:[#allocation2 + $0x18] sm:$0xff] (!%p1776_p7), %v2684_v0 }
 0x10b   : > { %419 = vst [vmem:[#allocation2 + $0x20] sm:$0xff] (!%p1776_p7), %v2684_v0  ;;  %420 = vst [vmem:[#allocation2 + $0x28] sm:$0xff] (!%p1776_p7), %v2684_v0 }
 0x10c   : > { %421 = vst [vmem:[#allocation2 + $0x30] sm:$0xff] (!%p1776_p7), %v2684_v0  ;;  %422 = vst [vmem:[#allocation2 + $0x38] sm:$0xff] (!%p1776_p7), %v2684_v0 }
 0x10d   : > { %423 = vst [vmem:[#allocation2 + $0x40] sm:$0xff] (!%p1776_p7), %v2684_v0  ;;  %424 = vst [vmem:[#allocation2 + $0x48] sm:$0xff] (!%p1776_p7), %v2684_v0 }
 0x10e   : > { %425 = vst [vmem:[#allocation2 + $0x50] sm:$0xff] (!%p1776_p7), %v2684_v0  ;;  %426 = vst [vmem:[#allocation2 + $0x58] sm:$0xff] (!%p1776_p7), %v2684_v0 }
 0x10f   : > { %427 = vst [vmem:[#allocation2 + $0x60] sm:$0xff] (!%p1776_p7), %v2684_v0  ;;  %428 = vst [vmem:[#allocation2 + $0x68] sm:$0xff] (!%p1776_p7), %v2684_v0 }
 0x110   : > { %429 = vst [vmem:[#allocation2 + $0x70] sm:$0xff] %v2684_v0  ;;  %430 = vst [vmem:[#allocation2 + $0x78] sm:$0xff] %v2684_v0 }
 0x111 PF: > { %v463_v1 = vld [vmem:[#allocation11] sm:$0xff]  ;;  %v464_v2 = vld [vmem:[#allocation11 + $0x8] sm:$0xff]  ;;  %v465_v3 = vld [vmem:[#allocation11 + $0x10] sm:$0xff]  ;;  %vm467_vm0 = vcmask 261120   ;;  %v789_v43 = vlaneseq  ;;  %s3697_s11 = sld [smem:[#allocation23_spill]] }
 0x112   : > { %v2060_v4 = vpack.c.bf16 %v464_v2, %v463_v1  ;;  %v466_v5 = vld [vmem:[#allocation11 + $0x18] sm:$0xff]  ;;  %v431_v6 = vld [vmem:[%s3133_s27] sm:$0xff]  ;;  %v432_v8 = vld [vmem:[%s3133_s27 + $0x8] sm:$0xff] }
 0x113   : > { %v2064_v7 = vpack.c.bf16 %v466_v5, %v465_v3  ;;  %1980 = vmatprep.mubr.msk.f32.mxu0 %vm467_vm0, %v431_v6  ;;  %v433_v9 = vld [vmem:[%s3133_s27 + $0x10] sm:$0xff]  ;;  %v434_v10 = vld [vmem:[%s3133_s27 + $0x18] sm:$0xff]  ;;  %v435_v11 = vld [vmem:[%s3133_s27 + $0x20] sm:$0xff]  ;;  %v3231_v44 = vand.u32 127, %v789_v43 }
 0x114   : > { %2061 = vmatprep.subr.bf16.mxu0 %v2060_v4  ;;  %v436_v12 = vld [vmem:[%s3133_s27 + $0x28] sm:$0xff]  ;;  %v437_v13 = vld [vmem:[%s3133_s27 + $0x30] sm:$0xff]  ;;  %v438_v14 = vld [vmem:[%s3133_s27 + $0x38] sm:$0xff] }
 0x115   : > { %2063 = vmatpush3.bf16.msra.mxu0 %v2060_v4  ;;  %v439_v15 = vld [vmem:[%s3133_s27 + $0x40] sm:$0xff]  ;;  %v440_v16 = vld [vmem:[%s3133_s27 + $0x48] sm:$0xff]  ;;  %v441_v17 = vld [vmem:[%s3133_s27 + $0x50] sm:$0xff]  ;;  %vm791_vm1 = vcmp.eq.s32.totalorder %v3231_v44, 16 }
 0x116   : > { %2065 = vmatprep.subr.bf16.mxu0 %v2064_v7  ;;  %v442_v18 = vld [vmem:[%s3133_s27 + $0x58] sm:$0xff]  ;;  %v443_v19 = vld [vmem:[%s3133_s27 + $0x60] sm:$0xff]  ;;  %v444_v20 = vld [vmem:[%s3133_s27 + $0x68] sm:$0xff] }
 0x117   : > { %v445_v21 = vld [vmem:[%s3133_s27 + $0x70] sm:$0xff]  ;;  %v446_v22 = vld [vmem:[%s3133_s27 + $0x78] sm:$0xff]  ;;  %v447_v23 = vld [vmem:[%s3133_s27 + $0x80] sm:$0xff]  ;;  %p1809_p8 = scmp.ne.s32.totalorder %s3697_s11, 1 }
 0x118   : > { %v448_v24 = vld [vmem:[%s3133_s27 + $0x88] sm:$0xff]  ;;  %v449_v25 = vld [vmem:[%s3133_s27 + $0x90] sm:$0xff]  ;;  %v450_v26 = vld [vmem:[%s3133_s27 + $0x98] sm:$0xff] }
 0x119   : > { %2067 = vmatpush3.bf16.msra.mxu0 %v2064_v7  ;;  %v451_v27 = vld [vmem:[%s3133_s27 + $0xa0] sm:$0xff]  ;;  %v452_v28 = vld [vmem:[%s3133_s27 + $0xa8] sm:$0xff]  ;;  %v453_v29 = vld [vmem:[%s3133_s27 + $0xb0] sm:$0xff] }
 0x11a   : > { %v454_v30 = vld [vmem:[%s3133_s27 + $0xb8] sm:$0xff]  ;;  %v455_v31 = vld [vmem:[%s3133_s27 + $0xc0] sm:$0xff]  ;;  %v456_v32 = vld [vmem:[%s3133_s27 + $0xc8] sm:$0xff] }
 0x11b   : > { %v457_v33 = vld [vmem:[%s3133_s27 + $0xd0] sm:$0xff]  ;;  %v458_v34 = vld [vmem:[%s3133_s27 + $0xd8] sm:$0xff]  ;;  %v459_v35 = vld [vmem:[%s3133_s27 + $0xe0] sm:$0xff] }
 0x11c   : > { %1981 = vmatmul.mubr.msk.f32.vlgmr.msra.gmra.mrb[0].mxu0 %vm467_vm0, %v432_v8  ;;  %v460_v36 = vld [vmem:[%s3133_s27 + $0xe8] sm:$0xff]  ;;  %v461_v37 = vld [vmem:[%s3133_s27 + $0xf0] sm:$0xff]  ;;  %v462_v38 = vld [vmem:[%s3133_s27 + $0xf8] sm:$0xff] }
 0x11d   : > { %1983 = vmatprep.mubr.msk.f32.mxu0 %vm467_vm0, %v433_v9  ;;  %v3224_v39 = vld [vmem:[%s3125_s24 + $0x18] sm:$0xff]  ;;  %v3228_v41 = vld [vmem:[%s3125_s24] sm:$0xff] }
 0x11e   : > { %v847_v40 = vunpack.c.h.bf16 %v3224_v39  ;;  %v841_v42 = vunpack.c.h.bf16 %v3228_v41 }
 0x120   : > { %1984 = vmatmul.mubr.msk.f32.gmra.mrb[2].mxu0 %vm467_vm0, %v434_v10  ;;  %967 = vmatprep.mubr.f32.mxu1 %v847_v40 }
 0x121   : > { %1986 = vmatprep.mubr.msk.f32.mxu0 %vm467_vm0, %v435_v11 }
 0x124   : > { %1987 = vmatmul.mubr.msk.f32.gmra.mrb[4].mxu0 %vm467_vm0, %v436_v12 }
 0x125   : > { %1989 = vmatprep.mubr.msk.f32.mxu0 %vm467_vm0, %v437_v13 }
 0x128   : > { %1990 = vmatmul.mubr.msk.f32.gmra.mrb[6].mxu0 %vm467_vm0, %v438_v14 }
 0x129   : > { %1992 = vmatprep.mubr.msk.f32.mxu0 %vm467_vm0, %v439_v15 }
 0x12c   : > { %1993 = vmatmul.mubr.msk.f32.gmra.mrb[8].mxu0 %vm467_vm0, %v440_v16 }
 0x12d   : > { %1995 = vmatprep.mubr.msk.f32.mxu0 %vm467_vm0, %v441_v17 }
 0x130   : > { %1996 = vmatmul.mubr.msk.f32.gmra.mrb[10].mxu0 %vm467_vm0, %v442_v18 }
 0x131   : > { %1998 = vmatprep.mubr.msk.f32.mxu0 %vm467_vm0, %v443_v19 }
 0x134   : > { %1999 = vmatmul.mubr.msk.f32.gmra.mrb[12].mxu0 %vm467_vm0, %v444_v20 }
 0x135   : > { %2001 = vmatprep.mubr.msk.f32.mxu0 %vm467_vm0, %v445_v21 }
 0x138   : > { %2002 = vmatmul.mubr.msk.f32.gmra.mrb[14].mxu0 %vm467_vm0, %v446_v22 }
 0x139   : > { %2004 = vmatprep.mubr.msk.f32.mxu0 %vm467_vm0, %v447_v23 }
 0x13c   : > { %2005 = vmatmul.mubr.msk.f32.gmra.mrb[16].mxu0 %vm467_vm0, %v448_v24 }
 0x13d   : > { %2007 = vmatprep.mubr.msk.f32.mxu0 %vm467_vm0, %v449_v25 }
 0x140   : > { %2008 = vmatmul.mubr.msk.f32.gmra.mrb[18].mxu0 %vm467_vm0, %v450_v26 }
 0x141   : > { %2010 = vmatprep.mubr.msk.f32.mxu0 %vm467_vm0, %v451_v27 }
 0x144   : > { %2011 = vmatmul.mubr.msk.f32.gmra.mrb[20].mxu0 %vm467_vm0, %v452_v28 }
 0x145   : > { %2013 = vmatprep.mubr.msk.f32.mxu0 %vm467_vm0, %v453_v29 }
 0x148   : > { %2014 = vmatmul.mubr.msk.f32.gmra.mrb[22].mxu0 %vm467_vm0, %v454_v30 }
 0x149   : > { %2016 = vmatprep.mubr.msk.f32.mxu0 %vm467_vm0, %v455_v31 }
 0x14c   : > { %2017 = vmatmul.mubr.msk.f32.gmra.mrb[24].mxu0 %vm467_vm0, %v456_v32 }
 0x14d   : > { %2019 = vmatprep.mubr.msk.f32.mxu0 %vm467_vm0, %v457_v33 }
 0x150   : > { %2020 = vmatmul.mubr.msk.f32.gmra.mrb[26].mxu0 %vm467_vm0, %v458_v34 }
 0x151   : > { %2022 = vmatprep.mubr.msk.f32.mxu0 %vm467_vm0, %v459_v35 }
 0x154   : > { %2023 = vmatmul.mubr.msk.f32.gmra.mrb[28].mxu0 %vm467_vm0, %v460_v36 }
 0x155   : > { %2025 = vmatprep.mubr.msk.f32.mxu0 %vm467_vm0, %v461_v37 }
 0x158   : > { %2026 = vmatmul.mubr.msk.f32.gmra.mrb[30].mxu0 %vm467_vm0, %v462_v38 }
 0x159   : > { %952 = vmatprep.mubr.f32.mxu0 %v841_v42 }
 0x1ef   : > { %v1982_v45 = vpop.f32.mrb[0].mxu0 }
 0x1f0   : > { %v793_v46 = vsel %vm791_vm1, 1.0, %v1982_v45  ;;  %v630_v47 = vpop.f32.mrb[1].mxu0 }
 0x1f1   : > { %v792_v48 = vsel %vm791_vm1, 1.0, %v630_v47 }
 0x1f2   : > { %v2070_v49 = vpack.c.bf16 %v793_v46, %v792_v48 }
 0x1f3   : > { %v1985_v50 = vpop.f32.mrb[2].mxu0 }
 0x1f4   : > { %v795_v51 = vsel %vm791_vm1, 1.0, %v1985_v50  ;;  %v640_v52 = vpop.f32.mrb[3].mxu0 }
 0x1f5   : > { %v794_v53 = vsel %vm791_vm1, 1.0, %v640_v52 }
 0x1f6   : > { %v2074_v54 = vpack.c.bf16 %v795_v51, %v794_v53 }
 0x1f7   : > { %v1988_v55 = vpop.f32.mrb[4].mxu0 }
 0x1f8   : > { %v797_v56 = vsel %vm791_vm1, 1.0, %v1988_v55  ;;  %v650_v57 = vpop.f32.mrb[5].mxu0 }
 0x1f9   : > { %v796_v58 = vsel %vm791_vm1, 1.0, %v650_v57 }
 0x1fa   : > { %v2078_v59 = vpack.c.bf16 %v797_v56, %v796_v58 }
 0x1fb   : > { %v1991_v60 = vpop.f32.mrb[6].mxu0 }
 0x1fc   : > { %v799_v61 = vsel %vm791_vm1, 1.0, %v1991_v60  ;;  %v660_v62 = vpop.f32.mrb[7].mxu0 }
 0x1fd   : > { %v798_v63 = vsel %vm791_vm1, 1.0, %v660_v62 }
 0x1fe   : > { %v2082_v0 = vpack.c.bf16 %v799_v61, %v798_v63 }
 0x1ff   : > { %v1994_v1 = vpop.f32.mrb[8].mxu0 }
 0x200   : > { %v801_v2 = vsel %vm791_vm1, 1.0, %v1994_v1  ;;  %v670_v3 = vpop.f32.mrb[9].mxu0  ;;  %v825_v1 = vld [vmem:[%s3125_s24 + $0x8] sm:$0xff] }
 0x201   : > { %v800_v4 = vsel %vm791_vm1, 1.0, %v670_v3  ;;  %v840_v3 = vunpack.c.l.bf16 %v3228_v41 }
 0x202   : > { %v3254_v5 = vpack.c.bf16 %v801_v2, %v800_v4  ;;  %v846_v2 = vunpack.c.l.bf16 %v3224_v39  ;;  %v843_v4 = vunpack.c.h.bf16 %v825_v1 }
 0x203   : > { %v1997_v6 = vpop.f32.mrb[10].mxu0 }
 0x204   : > { %v803_v7 = vsel %vm791_vm1, 1.0, %v1997_v6  ;;  %v680_v8 = vpop.f32.mrb[11].mxu0  ;;  %v826_v6 = vld [vmem:[%s3125_s24 + $0x10] sm:$0xff] }
 0x205   : > { %v802_v9 = vsel %vm791_vm1, 1.0, %v680_v8  ;;  %v842_v8 = vunpack.c.l.bf16 %v825_v1  ;;  %v845_v39 = vunpack.c.h.bf16 %v826_v6 }
 0x206   : > { %v3260_v10 = vpack.c.bf16 %v803_v7, %v802_v9 }
 0x207   : > { %v2000_v11 = vpop.f32.mrb[12].mxu0 }
 0x208   : > { %v805_v12 = vsel %vm791_vm1, 1.0, %v2000_v11  ;;  %v690_v13 = vpop.f32.mrb[13].mxu0  ;;  %v844_v11 = vunpack.c.l.bf16 %v826_v6 }
 0x209   : > { %v804_v14 = vsel %vm791_vm1, 1.0, %v690_v13  ;;  %v831_v13 = vld [vmem:[%s3125_s24 + $0x38] sm:$0xff] }
 0x20a   : > { %v3266_v15 = vpack.c.bf16 %v805_v12, %v804_v14 }
 0x20b   : > { %v2003_v16 = vpop.f32.mrb[14].mxu0 }
 0x20c   : > { %v807_v17 = vsel %vm791_vm1, 1.0, %v2003_v16  ;;  %v700_v18 = vpop.f32.mrb[15].mxu0  ;;  %v832_v16 = vld [vmem:[%s3125_s24 + $0x40] sm:$0xff] }
 0x20d   : > { %v806_v19 = vsel %vm791_vm1, 1.0, %v700_v18  ;;  %v857_v18 = vunpack.c.h.bf16 %v832_v16 }
 0x20e   : > { %v3272_v20 = vpack.c.bf16 %v807_v17, %v806_v19  ;;  %v854_v17 = vunpack.c.l.bf16 %v831_v13  ;;  %v833_v19 = vld [vmem:[%s3125_s24 + $0x48] sm:$0xff] }
 0x20f   : > { %v2006_v21 = vpop.f32.mrb[16].mxu0 }
 0x210   : > { %v809_v22 = vsel %vm791_vm1, 1.0, %v2006_v21  ;;  %v710_v23 = vpop.f32.mrb[17].mxu0  ;;  %v859_v21 = vunpack.c.h.bf16 %v833_v19 }
 0x211   : > { %v808_v24 = vsel %vm791_vm1, 1.0, %v710_v23  ;;  %v858_v23 = vunpack.c.l.bf16 %v833_v19 }
 0x212   : > { %v2068_v25 = vpack.c.bf16 %v809_v22, %v808_v24  ;;  %v834_v22 = vld [vmem:[%s3125_s24 + $0x50] sm:$0xff] }
 0x213   : > { %v2009_v26 = vpop.f32.mrb[18].mxu0  ;;  %v861_v24 = vunpack.c.h.bf16 %v834_v22 }
 0x214   : > { %v811_v27 = vsel %vm791_vm1, 1.0, %v2009_v26  ;;  %v720_v28 = vpop.f32.mrb[19].mxu0  ;;  %2069 = vmatprep.subr.bf16.mxu0 %v2068_v25  ;;  %2108 = vmatprep.subr.bf16.mxu1 %v2068_v25  ;;  %v835_v25 = vld [vmem:[%s3125_s24 + $0x58] sm:$0xff]  ;;  %v860_v26 = vunpack.c.l.bf16 %v834_v22 }
 0x215   : > { %v810_v29 = vsel %vm791_vm1, 1.0, %v720_v28  ;;  %2071 = vmatpush3.bf16.msra.mxu0 %v2070_v49  ;;  %2116 = vmatpush3.bf16.msra.mxu1 %v2070_v49  ;;  %v836_v28 = vld [vmem:[%s3125_s24 + $0x60] sm:$0xff] }
 0x216   : > { %v2072_v30 = vpack.c.bf16 %v811_v27, %v810_v29  ;;  %v863_v27 = vunpack.c.h.bf16 %v835_v25  ;;  %v862_v29 = vunpack.c.l.bf16 %v835_v25 }
 0x217   : > { %v2012_v31 = vpop.f32.mrb[20].mxu0 }
 0x218   : > { %v813_v32 = vsel %vm791_vm1, 1.0, %v2012_v31  ;;  %v730_v33 = vpop.f32.mrb[21].mxu0  ;;  %2073 = vmatprep.subr.bf16.mxu0 %v2072_v30  ;;  %2109 = vmatprep.subr.bf16.mxu1 %v2072_v30  ;;  %v865_v30 = vunpack.c.h.bf16 %v836_v28  ;;  %v837_v31 = vld [vmem:[%s3125_s24 + $0x68] sm:$0xff] }
 0x219   : > { %v812_v34 = vsel %vm791_vm1, 1.0, %v730_v33  ;;  %2075 = vmatpush3.bf16.msra.mxu0 %v2074_v54  ;;  %2117 = vmatpush3.bf16.msra.mxu1 %v2074_v54  ;;  %v867_v33 = vunpack.c.h.bf16 %v837_v31 }
 0x21a   : > { %v2076_v35 = vpack.c.bf16 %v813_v32, %v812_v34  ;;  %v864_v32 = vunpack.c.l.bf16 %v836_v28  ;;  %v838_v34 = vld [vmem:[%s3125_s24 + $0x70] sm:$0xff] }
 0x21b   : > { %v2015_v36 = vpop.f32.mrb[22].mxu0  ;;  %v882_v28 = vld [vmem:[#allocation2 + $0x50] sm:$0xff] }
 0x21c   : > { %v815_v37 = vsel %vm791_vm1, 1.0, %v2015_v36  ;;  %v740_v38 = vpop.f32.mrb[23].mxu0  ;;  %2077 = vmatprep.subr.bf16.mxu0 %v2076_v35  ;;  %2110 = vmatprep.subr.bf16.mxu1 %v2076_v35  ;;  %v866_v35 = vunpack.c.l.bf16 %v837_v31  ;;  %v869_v36 = vunpack.c.h.bf16 %v838_v34 }
 0x21d   : > { %v814_v40 = vsel %vm791_vm1, 1.0, %v740_v38  ;;  %2079 = vmatpush3.bf16.msra.mxu0 %v2078_v59  ;;  %2118 = vmatpush3.bf16.msra.mxu1 %v2078_v59  ;;  %v868_v38 = vunpack.c.l.bf16 %v838_v34 }
 0x21e   : > { %v2080_v42 = vpack.c.bf16 %v815_v37, %v814_v40  ;;  %v839_v37 = vld [vmem:[%s3125_s24 + $0x78] sm:$0xff] }
 0x21f   : > { %v2018_v43 = vpop.f32.mrb[24].mxu0  ;;  %v871_v40 = vunpack.c.h.bf16 %v839_v37 }
 0x220   : > { %v817_v45 = vsel %vm791_vm1, 1.0, %v2018_v43  ;;  %v750_v46 = vpop.f32.mrb[25].mxu0  ;;  %2081 = vmatprep.subr.bf16.mxu0 %v2080_v42  ;;  %2111 = vmatprep.subr.bf16.mxu1 %v2080_v42  ;;  %v870_v42 = vunpack.c.l.bf16 %v839_v37 }
 0x221   : > { %v816_v47 = vsel %vm791_vm1, 1.0, %v750_v46  ;;  %2083 = vmatpush3.bf16.msra.mxu0 %v2082_v0  ;;  %2119 = vmatpush3.bf16.msra.mxu1 %v2082_v0  ;;  %v828_v0 = vld [vmem:[%s3125_s24 + $0x20] sm:$0xff]  ;;  %v875_v46 = vld [vmem:[#allocation2 + $0x18] sm:$0xff] }
 0x222   : > { %v2084_v48 = vpack.c.bf16 %v817_v45, %v816_v47  ;;  %v849_v44 = vunpack.c.h.bf16 %v828_v0  ;;  %v848_v7 = vunpack.c.l.bf16 %v828_v0 }
 0x223   : > { %v2021_v49 = vpop.f32.mrb[26].mxu0 }
 0x224   : > { %v819_v50 = vsel %vm791_vm1, 1.0, %v2021_v49  ;;  %v760_v51 = vpop.f32.mrb[27].mxu0  ;;  %2085 = vmatprep.subr.bf16.mxu0 %v2084_v48  ;;  %2112 = vmatprep.subr.bf16.mxu1 %v2084_v48  ;;  %v872_v48 = vld [vmem:[#allocation2] sm:$0xff] }
 0x225   : > { %v818_v52 = vsel %vm791_vm1, 1.0, %v760_v51  ;;  %2087 = vmatpush3.bf16.msra.mxu0 %v3254_v5  ;;  %2120 = vmatpush3.bf16.msra.mxu1 %v3254_v5  ;;  %v829_v5 = vld [vmem:[%s3125_s24 + $0x28] sm:$0xff] }
 0x226   : > { %v2088_v53 = vpack.c.bf16 %v819_v50, %v818_v52  ;;  %v851_v9 = vunpack.c.h.bf16 %v829_v5  ;;  %v850_v41 = vunpack.c.l.bf16 %v829_v5 }
 0x227   : > { %v2024_v54 = vpop.f32.mrb[28].mxu0 }
 0x228   : > { %v821_v55 = vsel %vm791_vm1, 1.0, %v2024_v54  ;;  %v770_v56 = vpop.f32.mrb[29].mxu0  ;;  %2089 = vmatprep.subr.bf16.mxu0 %v2088_v53  ;;  %2113 = vmatprep.subr.bf16.mxu1 %v2088_v53 }
 0x229   : > { %v820_v57 = vsel %vm791_vm1, 1.0, %v770_v56  ;;  %2091 = vmatpush3.bf16.msra.mxu0 %v3260_v10  ;;  %2121 = vmatpush3.bf16.msra.mxu1 %v3260_v10  ;;  %v830_v10 = vld [vmem:[%s3125_s24 + $0x30] sm:$0xff]  ;;  %v876_v56 = vld [vmem:[#allocation2 + $0x20] sm:$0xff] }
 0x22a   : > { %v2092_v58 = vpack.c.bf16 %v821_v55, %v820_v57  ;;  %v853_v12 = vunpack.c.h.bf16 %v830_v10  ;;  %v852_v14 = vunpack.c.l.bf16 %v830_v10 }
 0x22b   : > { %v2027_v59 = vpop.f32.mrb[30].mxu0 }
 0x22c   : > { %v823_v60 = vsel %vm791_vm1, 1.0, %v2027_v59  ;;  %v780_v61 = vpop.f32.mrb[31].mxu0  ;;  %2093 = vmatprep.subr.bf16.mxu0 %v2092_v58  ;;  %2114 = vmatprep.subr.bf16.mxu1 %v2092_v58  ;;  %v873_v58 = vld [vmem:[#allocation2 + $0x8] sm:$0xff] }
 0x22d   : > { %v822_v62 = vsel %vm791_vm1, 1.0, %v780_v61  ;;  %2095 = vmatpush3.bf16.msra.mxu0 %v3266_v15  ;;  %2122 = vmatpush3.bf16.msra.mxu1 %v3266_v15  ;;  %v855_v15 = vunpack.c.h.bf16 %v831_v13  ;;  %v879_v13 = vld [vmem:[#allocation2 + $0x38] sm:$0xff] }
 0x22e   : > { %v2096_v63 = vpack.c.bf16 %v823_v60, %v822_v62 }
 0x230   : > { %2097 = vmatprep.subr.bf16.mxu0 %v2096_v63  ;;  %2115 = vmatprep.subr.bf16.mxu1 %v2096_v63 }
 0x231   : > { %2099 = vmatpush3.bf16.msra.mxu0 %v3272_v20  ;;  %2123 = vmatpush3.bf16.msra.mxu1 %v3272_v20  ;;  %v856_v20 = vunpack.c.l.bf16 %v832_v16 }
 0x234   : > { %968 = vmatmul.mubr.f32.vlgmr.msra.gmra.mrb[0].mxu1 %v846_v2  ;;  %953 = vmatmul.mubr.f32.vlgmr.msra.gmra.mrb[32].mxu0 %v840_v3  ;;  %v877_v2 = vld [vmem:[#allocation2 + $0x28] sm:$0xff] }
 0x235   : > { %972 = vmatprep.mubr.f32.mxu1 %v849_v44  ;;  %957 = vmatprep.mubr.f32.mxu0 %v843_v4  ;;  %v874_v44 = vld [vmem:[#allocation2 + $0x10] sm:$0xff] }
 0x238   : > { %973 = vmatmul.mubr.f32.gmra.mrb[2].mxu1 %v848_v7  ;;  %958 = vmatmul.mubr.f32.gmra.mrb[34].mxu0 %v842_v8 }
 0x239   : > { %977 = vmatprep.mubr.f32.mxu1 %v851_v9  ;;  %962 = vmatprep.mubr.f32.mxu0 %v845_v39  ;;  %v878_v39 = vld [vmem:[#allocation2 + $0x30] sm:$0xff] }
 0x23c   : > { %978 = vmatmul.mubr.f32.gmra.mrb[4].mxu1 %v850_v41  ;;  %963 = vmatmul.mubr.f32.gmra.mrb[36].mxu0 %v844_v11 }
 0x23d   : > { %982 = vmatprep.mubr.f32.mxu1 %v853_v12 }
 0x240   : > { %983 = vmatmul.mubr.f32.gmra.mrb[6].mxu1 %v852_v14 }
 0x241   : > { %987 = vmatprep.mubr.f32.mxu1 %v855_v15 }
 0x244   : > { %988 = vmatmul.mubr.f32.gmra.mrb[8].mxu1 %v854_v17 }
 0x245   : > { %992 = vmatprep.mubr.f32.mxu1 %v857_v18  ;;  %v880_v18 = vld [vmem:[#allocation2 + $0x40] sm:$0xff] }
 0x248   : > { %993 = vmatmul.mubr.f32.gmra.mrb[10].mxu1 %v856_v20 }
 0x249   : > { %997 = vmatprep.mubr.f32.mxu1 %v859_v21 }
 0x24c   : > { %998 = vmatmul.mubr.f32.gmra.mrb[12].mxu1 %v858_v23  ;;  %v881_v23 = vld [vmem:[#allocation2 + $0x48] sm:$0xff] }
 0x24d   : > { %1002 = vmatprep.mubr.f32.mxu1 %v861_v24 }
 0x250   : > { %1003 = vmatmul.mubr.f32.gmra.mrb[14].mxu1 %v860_v26 }
 0x251   : > { %1007 = vmatprep.mubr.f32.mxu1 %v863_v27 }
 0x254   : > { %1008 = vmatmul.mubr.f32.gmra.mrb[16].mxu1 %v862_v29 }
 0x255   : > { %1012 = vmatprep.mubr.f32.mxu1 %v865_v30 }
 0x258   : > { %1013 = vmatmul.mubr.f32.gmra.mrb[18].mxu1 %v864_v32 }
 0x259   : > { %1017 = vmatprep.mubr.f32.mxu1 %v867_v33  ;;  %v883_v33 = vld [vmem:[#allocation2 + $0x58] sm:$0xff] }
 0x25c   : > { %1018 = vmatmul.mubr.f32.gmra.mrb[20].mxu1 %v866_v35 }
 0x25d   : > { %1022 = vmatprep.mubr.f32.mxu1 %v869_v36 }
 0x260   : > { %1023 = vmatmul.mubr.f32.gmra.mrb[22].mxu1 %v868_v38  ;;  %v884_v38 = vld [vmem:[#allocation2 + $0x60] sm:$0xff] }
 0x261   : > { %1027 = vmatprep.mubr.f32.mxu1 %v871_v40 }
 0x264   : > { %1028 = vmatmul.mubr.f32.gmra.mrb[24].mxu1 %v870_v42 }
 0x307   : > { %v1913_v43 = vpop.f32.mrb[0].mxu1  ;;  %v1904_v45 = vpop.f32.mrb[32].mxu0 }
 0x308   : > { %v1914_v47 = vpop.f32.mrb[1].mxu1  ;;  %v1905_v49 = vpop.f32.mrb[33].mxu0 }
 0x309   : > { %v1915_v50 = vadd.f32 %v1914_v47, %v1913_v43  ;;  %v1906_v51 = vadd.f32 %v1905_v49, %v1904_v45 }
 0x30b   : > { %v1036_v52 = vadd.f32 %v1915_v50, %v875_v46  ;;  %v1916_v53 = vpop.f32.mrb[2].mxu1  ;;  %v1033_v54 = vadd.f32 %v1906_v51, %v872_v48  ;;  %v1907_v55 = vpop.f32.mrb[34].mxu0  ;;  %v885_v46 = vld [vmem:[#allocation2 + $0x68] sm:$0xff]  ;;  %v886_v51 = vld [vmem:[#allocation2 + $0x70] sm:$0xff] }
 0x30c   : > { %v1917_v57 = vpop.f32.mrb[3].mxu1  ;;  %v1908_v59 = vpop.f32.mrb[35].mxu0 }
 0x30d   : > { %1052 = vst [vmem:[#allocation2 + $0x18] sm:$0xff] %v1036_v52  ;;  %v1918_v60 = vadd.f32 %v1917_v57, %v1916_v53  ;;  %1049 = vst [vmem:[#allocation2] sm:$0xff] %v1033_v54  ;;  %v1909_v61 = vadd.f32 %v1908_v59, %v1907_v55 }
 0x30f   : > { %v1037_v62 = vadd.f32 %v1918_v60, %v876_v56  ;;  %v1919_v63 = vpop.f32.mrb[4].mxu1  ;;  %v1034_v0 = vadd.f32 %v1909_v61, %v873_v58  ;;  %v1910_v1 = vpop.f32.mrb[36].mxu0  ;;  %v887_v56 = vld [vmem:[#allocation2 + $0x78] sm:$0xff]  ;;  %v1341_v60 = vld [vmem:[#allocation9] sm:$0xff] (!%p1809_p8)  ;;  %v1342_v61 = vld [vmem:[#allocation9 + $0x8] sm:$0xff] (!%p1809_p8) }
 0x310   : > { %v1920_v3 = vpop.f32.mrb[5].mxu1  ;;  %v1911_v4 = vpop.f32.mrb[37].mxu0 }
 0x311   : > { %1053 = vst [vmem:[#allocation2 + $0x20] sm:$0xff] %v1037_v62  ;;  %v1921_v5 = vadd.f32 %v1920_v3, %v1919_v63  ;;  %1050 = vst [vmem:[#allocation2 + $0x8] sm:$0xff] %v1034_v0  ;;  %v1912_v6 = vadd.f32 %v1911_v4, %v1910_v1  ;;  %v1343_v62 = vld [vmem:[#allocation9 + $0x10] sm:$0xff] (!%p1809_p8)  ;;  %v2100_v63 = vpack.c.bf16 (!%p1809_p8), %v1342_v61, %v1341_v60  ;;  %v1344_v0 = vld [vmem:[#allocation9 + $0x18] sm:$0xff] (!%p1809_p8)  ;;  %v2685_v3 = vmov (!%p1809_p8), 16  }
 0x312   : > { %v1325_v1 = vld [vmem:[%s3142_s19] sm:$0xff] (!%p1809_p8)  ;;  %2304 = vset.pattern.permute.xlu1 (!%p1809_p8), %v2685_v3  ;;  %2303 = vset.pattern.permute.xlu0 (!%p1809_p8), %v2685_v3  ;;  %v2686_v3 = vmov (!%p1809_p8), 0  }
 0x313   : > { %v1038_v7 = vadd.f32 %v1921_v5, %v877_v2  ;;  %v1922_v8 = vpop.f32.mrb[6].mxu1  ;;  %v1035_v9 = vadd.f32 %v1912_v6, %v874_v44  ;;  %v1333_v2 = vld [vmem:[%s3142_s19 + $0x40] sm:$0xff] (!%p1809_p8)  ;;  %v2104_v44 = vpack.c.bf16 (!%p1809_p8), %v1344_v0, %v1343_v62  ;;  %2036 = vmatprep.mubr.msk.f32.mxu0 (!%p1809_p8), %vm467_vm0, %v1325_v1  ;;  %2101 = vmatprep.subr.bf16.mxu0 (!%p1809_p8), %v2100_v63 }
 0x314   : > { %v1923_v10 = vpop.f32.mrb[7].mxu1  ;;  %2048 = vmatprep.mubr.msk.f32.mxu1 (!%p1809_p8), %vm467_vm0, %v1333_v2  ;;  %2124 = vmatprep.subr.bf16.mxu1 (!%p1809_p8), %v2100_v63  ;;  %v3337_v5 = vld [vmem:[#allocation2] sm:$0xff] (!%p1809_p8) }
 0x315   : > { %1054 = vst [vmem:[#allocation2 + $0x28] sm:$0xff] %v1038_v7  ;;  %v1924_v41 = vadd.f32 %v1923_v10, %v1922_v8  ;;  %1051 = vst [vmem:[#allocation2 + $0x10] sm:$0xff] %v1035_v9  ;;  %2103 = vmatpush3.bf16.msra.mxu0 (!%p1809_p8), %v2100_v63  ;;  %2126 = vmatpush3.bf16.msra.mxu1 (!%p1809_p8), %v2100_v63  ;;  %v1085_v7 = vmax.f32 (!%p1809_p8), %v3337_v5, 1.0  ;;  %v3341_v8 = vld [vmem:[#allocation2 + $0x18] sm:$0xff] (!%p1809_p8)  ;;  %vm1117_vm3 = vcmp.gt.f32.partialorder (!%p1809_p8), %v3337_v5, 0.0 }
 0x316   : > { %2105 = vmatprep.subr.bf16.mxu0 (!%p1809_p8), %v2104_v44  ;;  %2125 = vmatprep.subr.bf16.mxu1 (!%p1809_p8), %v2104_v44  ;;  %vm1120_vm4 = vcmp.gt.f32.partialorder (!%p1809_p8), %v3341_v8, 0.0 }
 0x317   : > { %v1039_v11 = vadd.f32 %v1924_v41, %v878_v39  ;;  %v1925_v12 = vpop.f32.mrb[8].mxu1  ;;  %v1088_v39 = vmax.f32 (!%p1809_p8), %v3341_v8, 1.0 }
 0x318   : > { %v1926_v14 = vpop.f32.mrb[9].mxu1  ;;  %v3343_v9 = vld [vmem:[#allocation2 + $0x8] sm:$0xff] (!%p1809_p8) }
 0x319   : > { %1055 = vst [vmem:[#allocation2 + $0x30] sm:$0xff] %v1039_v11  ;;  %v1927_v15 = vadd.f32 %v1926_v14, %v1925_v12  ;;  %v1086_v10 = vmax.f32 (!%p1809_p8), %v3343_v9, 1.0  ;;  %v3349_v11 = vld [vmem:[#allocation2 + $0x20] sm:$0xff] (!%p1809_p8)  ;;  %2107 = vmatpush3.bf16.msra.mxu0 (!%p1809_p8), %v2104_v44  ;;  %2127 = vmatpush3.bf16.msra.mxu1 (!%p1809_p8), %v2104_v44  ;;  %v1326_v12 = vld [vmem:[%s3142_s19 + $0x8] sm:$0xff] (!%p1809_p8)  ;;  %vm1118_vm2 = vcmp.gt.f32.partialorder (!%p1809_p8), %v3343_v9, 0.0 }
 0x31a   : > { %v1230_v44 = vsel (!%p1809_p8), %vm1118_vm2, 1, %v2686_v3  ;;  %vm1121_vm7 = vcmp.gt.f32.partialorder (!%p1809_p8), %v3349_v11, 0.0 }
 0x31b   : > { %v1040_v16 = vadd.f32 %v1927_v15, %v879_v13  ;;  %v1928_v17 = vpop.f32.mrb[10].mxu1  ;;  %v1334_v13 = vld [vmem:[%s3142_s19 + $0x48] sm:$0xff] (!%p1809_p8)  ;;  %v1327_v15 = vld [vmem:[%s3142_s19 + $0x10] sm:$0xff] (!%p1809_p8) }
 0x31c   : > { %v1929_v19 = vpop.f32.mrb[11].mxu1  ;;  %v3335_v4 = vld [vmem:[#allocation2 + $0x10] sm:$0xff] (!%p1809_p8)  ;;  %v3347_v41 = vld [vmem:[#allocation2 + $0x28] sm:$0xff] (!%p1809_p8)  ;;  %2037 = vmatmul.mubr.msk.f32.vlgmr.msra.gmra.mrb[0].mxu0 (!%p1809_p8), %vm467_vm0, %v1326_v12  ;;  %2049 = vmatmul.mubr.msk.f32.vlgmr.msra.gmra.mrb[0].mxu1 (!%p1809_p8), %vm467_vm0, %v1334_v13  ;;  %v1233_v12 = vsel (!%p1809_p8), %vm1121_vm7, 1, %v2686_v3 }
 0x31d   : > { %1056 = vst [vmem:[#allocation2 + $0x38] sm:$0xff] %v1040_v16  ;;  %v1930_v20 = vadd.f32 %v1929_v19, %v1928_v17  ;;  %v1087_v6 = vmax.f32 (!%p1809_p8), %v3335_v4, 1.0  ;;  %v1090_v14 = vmax.f32 (!%p1809_p8), %v3347_v41, 1.0  ;;  %v1335_v16 = vld [vmem:[%s3142_s19 + $0x50] sm:$0xff] (!%p1809_p8)  ;;  %v1089_v17 = vmax.f32 (!%p1809_p8), %v3349_v11, 1.0  ;;  %2039 = vmatprep.mubr.msk.f32.mxu0 (!%p1809_p8), %vm467_vm0, %v1327_v15 }
 0x31e   : > { %2051 = vmatprep.mubr.msk.f32.mxu1 (!%p1809_p8), %vm467_vm0, %v1335_v16  ;;  %vm1119_vm5 = vcmp.gt.f32.partialorder (!%p1809_p8), %v3335_v4, 0.0  ;;  %vm1122_vm6 = vcmp.gt.f32.partialorder (!%p1809_p8), %v3347_v41, 0.0 }
 0x31f   : > { %v1041_v21 = vadd.f32 %v1930_v20, %v880_v18  ;;  %v1931_v22 = vpop.f32.mrb[12].mxu1  ;;  %2305 = vrcp.f32 (!%p1809_p8), %v1087_v6  ;;  %v1328_v20 = vld [vmem:[%s3142_s19 + $0x18] sm:$0xff] (!%p1809_p8)  ;;  %v1229_v6 = vsel (!%p1809_p8), %vm1117_vm3, 1, %v2686_v3 }
 0x320   : > { %v1932_v24 = vpop.f32.mrb[13].mxu1  ;;  %2307 = vrcp.f32 (!%p1809_p8), %v1085_v7  ;;  %v3359_v19 = vld [vmem:[#allocation2 + $0x30] sm:$0xff] (!%p1809_p8)  ;;  %2040 = vmatmul.mubr.msk.f32.gmra.mrb[2].mxu0 (!%p1809_p8), %vm467_vm0, %v1328_v20  ;;  %v1232_v7 = vsel (!%p1809_p8), %vm1120_vm4, 1, %v2686_v3 }
 0x321   : > { %1057 = vst [vmem:[#allocation2 + $0x40] sm:$0xff] %v1041_v21  ;;  %v1933_v25 = vadd.f32 %v1932_v24, %v1931_v22  ;;  %2309 = vrcp.f32 (!%p1809_p8), %v1088_v39  ;;  %v1336_v21 = vld [vmem:[%s3142_s19 + $0x58] sm:$0xff] (!%p1809_p8)  ;;  %v1337_v24 = vld [vmem:[%s3142_s19 + $0x60] sm:$0xff] (!%p1809_p8)  ;;  %v1231_v39 = vsel (!%p1809_p8), %vm1119_vm5, 1, %v2686_v3  ;;  %vm1123_vm9 = vcmp.gt.f32.partialorder (!%p1809_p8), %v3359_v19, 0.0 }
 0x322   : > { %2311 = vrcp.f32 (!%p1809_p8), %v1086_v10  ;;  %2052 = vmatmul.mubr.msk.f32.gmra.mrb[2].mxu1 (!%p1809_p8), %vm467_vm0, %v1336_v21  ;;  %v1234_v10 = vsel (!%p1809_p8), %vm1122_vm6, 1, %v2686_v3 }
 0x323   : > { %v1042_v26 = vadd.f32 %v1933_v25, %v881_v23  ;;  %v1934_v27 = vpop.f32.mrb[14].mxu1  ;;  %2313 = vrcp.f32 (!%p1809_p8), %v1090_v14  ;;  %v1329_v23 = vld [vmem:[%s3142_s19 + $0x20] sm:$0xff] (!%p1809_p8)  ;;  %v1091_v25 = vmax.f32 (!%p1809_p8), %v3359_v19, 1.0  ;;  %2054 = vmatprep.mubr.msk.f32.mxu1 (!%p1809_p8), %vm467_vm0, %v1337_v24  ;;  %v1235_v14 = vsel (!%p1809_p8), %vm1123_vm9, 1, %v2686_v3 }
 0x324   : > { %v1935_v29 = vpop.f32.mrb[15].mxu1  ;;  %v3357_v18 = vld [vmem:[#allocation2 + $0x38] sm:$0xff] (!%p1809_p8)  ;;  %2315 = vrcp.f32 (!%p1809_p8), %v1089_v17  ;;  %2042 = vmatprep.mubr.msk.f32.mxu0 (!%p1809_p8), %vm467_vm0, %v1329_v23 }
 0x325   : > { %1058 = vst [vmem:[#allocation2 + $0x48] sm:$0xff] %v1042_v26  ;;  %v1936_v30 = vadd.f32 %v1935_v29, %v1934_v27  ;;  %v1092_v22 = vmax.f32 (!%p1809_p8), %v3357_v18, 1.0  ;;  %v1330_v29 = vld [vmem:[%s3142_s19 + $0x28] sm:$0xff] (!%p1809_p8)  ;;  %vm1124_vm8 = vcmp.gt.f32.partialorder (!%p1809_p8), %v3357_v18, 0.0 }
 0x326   : > { %2043 = vmatmul.mubr.msk.f32.gmra.mrb[4].mxu0 (!%p1809_p8), %vm467_vm0, %v1330_v29  ;;  %v1236_v13 = vsel (!%p1809_p8), %vm1124_vm8, 1, %v2686_v3 }
 0x327   : > { %v1043_v31 = vadd.f32 %v1936_v30, %v882_v28  ;;  %v1937_v32 = vpop.f32.mrb[16].mxu1  ;;  %v1338_v30 = vld [vmem:[%s3142_s19 + $0x68] sm:$0xff] (!%p1809_p8)  ;;  %2317 = vrcp.f32 (!%p1809_p8), %v1092_v22 }
 0x328   : > { %v1938_v34 = vpop.f32.mrb[17].mxu1  ;;  %v3373_v27 = vld [vmem:[#allocation2 + $0x40] sm:$0xff] (!%p1809_p8)  ;;  %2319 = vrcp.f32 (!%p1809_p8), %v1091_v25  ;;  %2055 = vmatmul.mubr.msk.f32.gmra.mrb[4].mxu1 (!%p1809_p8), %vm467_vm0, %v1338_v30 }
 0x329   : > { %1059 = vst [vmem:[#allocation2 + $0x50] sm:$0xff] %v1043_v31  ;;  %v1939_v35 = vadd.f32 %v1938_v34, %v1937_v32  ;;  %v2306_v28 = vpop.eup (!%p1809_p8), %2305  ;;  %v1339_v34 = vld [vmem:[%s3142_s19 + $0x70] sm:$0xff] (!%p1809_p8)  ;;  %vm1125_vm11 = vcmp.gt.f32.partialorder (!%p1809_p8), %v3373_v27, 0.0 }
 0x32a   : > { %v2308_v32 = vpop.eup (!%p1809_p8), %2307  ;;  %1145 = vperm.xlu1 (!%p1809_p8), %2304, %v2306_v28   ;;  %2057 = vmatprep.mubr.msk.f32.mxu1 (!%p1809_p8), %vm467_vm0, %v1339_v34  ;;  %v1237_v16 = vsel (!%p1809_p8), %vm1125_vm11, 1, %v2686_v3 }
 0x32b   : > { %v1044_v36 = vadd.f32 %v1939_v35, %v883_v33  ;;  %v1940_v37 = vpop.f32.mrb[18].mxu1  ;;  %v1331_v33 = vld [vmem:[%s3142_s19 + $0x30] sm:$0xff] (!%p1809_p8)  ;;  %v1093_v35 = vmax.f32 (!%p1809_p8), %v3373_v27, 1.0  ;;  %1135 = vperm.xlu0 (!%p1809_p8), %2303, %v2308_v32  }
 0x32c   : > { %v1941_v40 = vpop.f32.mrb[19].mxu1  ;;  %v3371_v26 = vld [vmem:[#allocation2 + $0x48] sm:$0xff] (!%p1809_p8)  ;;  %2045 = vmatprep.mubr.msk.f32.mxu0 (!%p1809_p8), %vm467_vm0, %v1331_v33 }
 0x32d   : > { %1060 = vst [vmem:[#allocation2 + $0x58] sm:$0xff] %v1044_v36  ;;  %v1942_v42 = vadd.f32 %v1941_v40, %v1940_v37  ;;  %v1094_v31 = vmax.f32 (!%p1809_p8), %v3371_v26, 1.0  ;;  %v2310_v37 = vpop.eup (!%p1809_p8), %2309  ;;  %vm1126_vm10 = vcmp.gt.f32.partialorder (!%p1809_p8), %v3371_v26, 0.0 }
 0x32e   : > { %v2312_v40 = vpop.eup (!%p1809_p8), %2311  ;;  %1150 = vperm.xlu1 (!%p1809_p8), %2304, %v2310_v37   ;;  %v1238_v15 = vsel (!%p1809_p8), %vm1126_vm10, 1, %v2686_v3 }
 0x32f   : > { %v1045_v43 = vadd.f32 %v1942_v42, %v884_v38  ;;  %v1943_v45 = vpop.f32.mrb[20].mxu1  ;;  %v1332_v42 = vld [vmem:[%s3142_s19 + $0x38] sm:$0xff] (!%p1809_p8)  ;;  %2321 = vrcp.f32 (!%p1809_p8), %v1094_v31  ;;  %1140 = vperm.xlu0 (!%p1809_p8), %2303, %v2312_v40  }
 0x330   : > { %v1944_v47 = vpop.f32.mrb[21].mxu1  ;;  %v3387_v38 = vld [vmem:[#allocation2 + $0x50] sm:$0xff] (!%p1809_p8)  ;;  %2323 = vrcp.f32 (!%p1809_p8), %v1093_v35  ;;  %2046 = vmatmul.mubr.msk.f32.gmra.mrb[6].mxu0 (!%p1809_p8), %vm467_vm0, %v1332_v42 }
 0x331   : > { %1061 = vst [vmem:[#allocation2 + $0x60] sm:$0xff] %v1045_v43  ;;  %v1945_v48 = vadd.f32 %v1944_v47, %v1943_v45  ;;  %v1340_v43 = vld [vmem:[%s3142_s19 + $0x78] sm:$0xff] (!%p1809_p8)  ;;  %vm1127_vm13 = vcmp.gt.f32.partialorder (!%p1809_p8), %v3387_v38, 0.0 }
 0x332   : > { %2058 = vmatmul.mubr.msk.f32.gmra.mrb[6].mxu1 (!%p1809_p8), %vm467_vm0, %v1340_v43  ;;  %v1239_v20 = vsel (!%p1809_p8), %vm1127_vm13, 1, %v2686_v3 }
 0x333   : > { %v1046_v49 = vadd.f32 %v1945_v48, %v885_v46  ;;  %v1946_v50 = vpop.f32.mrb[22].mxu1  ;;  %v1095_v46 = vmax.f32 (!%p1809_p8), %v3387_v38, 1.0  ;;  %v2314_v48 = vpop.eup (!%p1809_p8), %2313 }
 0x334   : > { %v1947_v52 = vpop.f32.mrb[23].mxu1  ;;  %v3385_v36 = vld [vmem:[#allocation2 + $0x58] sm:$0xff] (!%p1809_p8)  ;;  %1160 = vperm.xlu1 (!%p1809_p8), %2304, %v2314_v48  }
 0x335   : > { %1062 = vst [vmem:[#allocation2 + $0x68] sm:$0xff] %v1046_v49  ;;  %v1948_v53 = vadd.f32 %v1947_v52, %v1946_v50  ;;  %v1096_v45 = vmax.f32 (!%p1809_p8), %v3385_v36, 1.0  ;;  %v2316_v50 = vpop.eup (!%p1809_p8), %2315  ;;  %vm1128_vm12 = vcmp.gt.f32.partialorder (!%p1809_p8), %v3385_v36, 0.0 }
 0x336   : > { %1155 = vperm.xlu0 (!%p1809_p8), %2303, %v2316_v50   ;;  %v1240_v17 = vsel (!%p1809_p8), %vm1128_vm12, 1, %v2686_v3 }
 0x337   : > { %v1047_v54 = vadd.f32 %v1948_v53, %v886_v51  ;;  %v1949_v55 = vpop.f32.mrb[24].mxu1  ;;  %1068 = sbr.rel (%p1809_p8) target bundleno = 1036 (0x40c), region = 76  ;;  %2325 = vrcp.f32 (!%p1809_p8), %v1096_v45 }
 0x338   : > { %v1950_v57 = vpop.f32.mrb[25].mxu1  ;;  %v3399_v49 = vld [vmem:[#allocation2 + $0x60] sm:$0xff] (!%p1809_p8)  ;;  %2327 = vrcp.f32 (!%p1809_p8), %v1095_v46 }
 0x339   : > { %1063 = vst [vmem:[#allocation2 + $0x70] sm:$0xff] %v1047_v54  ;;  %v1951_v58 = vadd.f32 %v1950_v57, %v1949_v55  ;;  %v1097_v52 = vmax.f32 (!%p1809_p8), %v3399_v49, 1.0  ;;  %v2318_v54 = vpop.eup (!%p1809_p8), %2317  ;;  %vm1129_vm15 = vcmp.gt.f32.partialorder (!%p1809_p8), %v3399_v49, 0.0 }
 0x33a   : > { %1170 = vperm.xlu1 (!%p1809_p8), %2304, %v2318_v54   ;;  %v1241_v22 = vsel (!%p1809_p8), %vm1129_vm15, 1, %v2686_v3 }
 0x33b   : > { %v1048_v59 = vadd.f32 %v1951_v58, %v887_v56  ;;  %v2320_v56 = vpop.eup (!%p1809_p8), %2319 }
 0x33c   : > { %v3397_v47 = vld [vmem:[#allocation2 + $0x68] sm:$0xff] (!%p1809_p8)  ;;  %1165 = vperm.xlu0 (!%p1809_p8), %2303, %v2320_v56  }
 0x33d   : > { %1064 = vst [vmem:[#allocation2 + $0x78] sm:$0xff] %v1048_v59  ;;  %v1098_v51 = vmax.f32 (!%p1809_p8), %v3397_v47, 1.0  ;;  %v2322_v59 = vpop.eup (!%p1809_p8), %2321  ;;  %vm1130_vm14 = vcmp.gt.f32.partialorder (!%p1809_p8), %v3397_v47, 0.0 }
 0x33e   : > { %v2324_v60 = vpop.eup %2323  ;;  %1180 = vperm.xlu1 %2304, %v2322_v59   ;;  %v1242_v21 = vsel %vm1130_vm14, 1, %v2686_v3 }
 0x33f   : > { %2329 = vrcp.f32 %v1098_v51 }
 0x340   : > { %v3407_v55 = vld [vmem:[#allocation2 + $0x70] sm:$0xff]  ;;  %2331 = vrcp.f32 %v1097_v52  ;;  %1175 = vperm.xlu0 %2303, %v2324_v60  }
 0x341   : > { %v1099_v58 = vmax.f32 %v3407_v55, 1.0  ;;  %v2326_v61 = vpop.eup %2325  ;;  %vm1131_vm1 = vcmp.gt.f32.partialorder %v3407_v55, 0.0 }
 0x342   : > { %v2328_v62 = vpop.eup %2327  ;;  %1190 = vperm.xlu1 %2304, %v2326_v61   ;;  %v1243_v24 = vsel %vm1131_vm1, 1, %v2686_v3 }
 0x344   : > { %v3405_v53 = vld [vmem:[#allocation2 + $0x78] sm:$0xff]  ;;  %1185 = vperm.xlu0 %2303, %v2328_v62  }
 0x345   : > { %v1100_v57 = vmax.f32 %v3405_v53, 1.0  ;;  %vm1132_vm0 = vcmp.gt.f32.partialorder %v3405_v53, 0.0 }
 0x346   : > { %v1244_v23 = vsel %vm1132_vm0, 1, %v2686_v3 }
 0x347   : > { %2333 = vrcp.f32 %v1100_v57 }
 0x348   : > { %2335 = vrcp.f32 %v1099_v58 }
 0x349   : > { %v2330_v63 = vpop.eup %2329 }
 0x34a   : > { %v2332_v0 = vpop.eup %2331  ;;  %1200 = vperm.xlu1 %2304, %v2330_v63  }
 0x34b   : > { %1195 = vperm.xlu0 %2303, %v2332_v0  }
 0x351   : > { %v2334_v1 = vpop.eup %2333 }
 0x352   : > { %v2336_v2 = vpop.eup %2335  ;;  %1210 = vperm.xlu1 %2304, %v2334_v1  }
 0x353   : > { %1205 = vperm.xlu0 %2303, %v2336_v2  }
 0x356   : > { %1249 = vperm.xlu1 %2304, %v1230_v44  }
 0x357   : > { %1246 = vperm.xlu0 %2303, %v1229_v6  }
 0x35a   : > { %1255 = vperm.xlu1 %2304, %v1232_v7  }
 0x35b   : > { %1252 = vperm.xlu0 %2303, %v1231_v39  }
 0x35e   : > { %1261 = vperm.xlu1 %2304, %v1234_v10   ;;  %v3458_v10 = vld [vmem:[#allocation12] ss:$0 sm:$0xff] }
 0x35f   : > { %1258 = vperm.xlu0 %2303, %v1233_v12  }
 0x362   : > { %1267 = vperm.xlu1 %2304, %v1236_v13  }
 0x363   : > { %1264 = vperm.xlu0 %2303, %v1235_v14  }
 0x366   : > { %1273 = vperm.xlu1 %2304, %v1238_v15  }
 0x367   : > { %1270 = vperm.xlu0 %2303, %v1237_v16  }
 0x36a   : > { %1279 = vperm.xlu1 %2304, %v1240_v17  }
 0x36b   : > { %1276 = vperm.xlu0 %2303, %v1239_v20  }
 0x36e   : > { %1285 = vperm.xlu1 %2304, %v1242_v21  }
 0x36f   : > { %1282 = vperm.xlu0 %2303, %v1241_v22  }
 0x372   : > { %1291 = vperm.xlu1 %2304, %v1244_v23  }
 0x373   : > { %1288 = vperm.xlu0 %2303, %v1243_v24  }
 0x3a9   : > { %v1146_v25 = vpop.permute.xlu1 %1145 }
 0x3aa   : > { %v1136_v28 = vpop.permute.xlu0 %1135  ;;  %v1215_v0 = vmul.f32 %v1146_v25, %v3335_v4 }
 0x3ab   : > { %v1213_v1 = vmul.f32 %v1136_v28, %v3337_v5 }
 0x3ad   : > { %v1151_v29 = vpop.permute.xlu1 %1150 }
 0x3ae   : > { %v1141_v30 = vpop.permute.xlu0 %1140  ;;  %v1216_v2 = vmul.f32 %v1151_v29, %v3341_v8 }
 0x3af   : > { %v1214_v3 = vmul.f32 %v1141_v30, %v3343_v9 }
 0x3b3   : > { %v1161_v31 = vpop.permute.xlu1 %1160 }
 0x3b4   : > { %v1218_v44 = vmul.f32 %v1161_v31, %v3347_v41 }
 0x3b5   : > { %v1156_v32 = vpop.permute.xlu0 %1155 }
 0x3b6   : > { %v1217_v6 = vmul.f32 %v1156_v32, %v3349_v11 }
 0x3b9   : > { %v1171_v33 = vpop.permute.xlu1 %1170 }
 0x3ba   : > { %v3448_v7 = vmul.f32 %v1171_v33, %v3357_v18 }
 0x3bb   : > { %v3427_v34 = vpop.permute.xlu0 %1165 }
 0x3bd   : > { %v1181_v35 = vpop.permute.xlu1 %1180 }
 0x3be   : > { %v1222_v39 = vmul.f32 %v1181_v35, %v3371_v26 }
 0x3bf   : > { %v1176_v37 = vpop.permute.xlu0 %1175 }
 0x3c0   : > { %v1221_v4 = vmul.f32 %v1176_v37, %v3373_v27 }
 0x3c1   : > { %v1191_v40 = vpop.permute.xlu1 %1190 }
 0x3c2   : > { %v1224_v5 = vmul.f32 %v1191_v40, %v3385_v36 }
 0x3c3   : > { %v1186_v42 = vpop.permute.xlu0 %1185 }
 0x3c4   : > { %v1223_v8 = vmul.f32 %v1186_v42, %v3387_v38 }
 0x3c9   : > { %v1201_v43 = vpop.permute.xlu1 %1200 }
 0x3ca   : > { %v1196_v45 = vpop.permute.xlu0 %1195  ;;  %v1226_v9 = vmul.f32 %v1201_v43, %v3397_v47 }
 0x3cb   : > { %v3456_v41 = vmul.f32 %v1196_v45, %v3399_v49 }
 0x3d1   : > { %v3429_v46 = vpop.permute.xlu1 %1210 }
 0x3d2   : > { %v3431_v48 = vpop.permute.xlu0 %1205  ;;  %v1228_v40 = vmul.f32 %v3429_v46, %v3405_v53 }
 0x3d5   : > { %v1250_v50 = vpop.permute.xlu1 %1249 }
 0x3d6   : > { %v1247_v51 = vpop.permute.xlu0 %1246  ;;  %vm1294_vm2 = vcmp.eq.s32.totalorder %v1250_v50, 1 }
 0x3d7   : > { %vm1293_vm3 = vcmp.eq.s32.totalorder %v1247_v51, 1  ;;  %v1310_v12 = vsel %vm1294_vm2, %v1214_v3, 0.0 }
 0x3d8   : > { %v1309_v36 = vsel %vm1293_vm3, %v1213_v1, 0.0 }
 0x3d9   : > { %v1256_v52 = vpop.permute.xlu1 %1255 }
 0x3da   : > { %v1253_v54 = vpop.permute.xlu0 %1252  ;;  %vm1296_vm6 = vcmp.eq.s32.totalorder %v1256_v52, 1 }
 0x3db   : > { %vm1295_vm7 = vcmp.eq.s32.totalorder %v1253_v54, 1  ;;  %v1312_v20 = vsel %vm1296_vm6, %v1216_v2, 0.0 }
 0x3dc   : > { %v1311_v23 = vsel %vm1295_vm7, %v1215_v0, 0.0 }
 0x3dd   : > { %v3433_v56 = vpop.permute.xlu1 %1261 }
 0x3de   : > { %v3435_v57 = vpop.permute.xlu0 %1258  ;;  %vm1298_vm10 = vcmp.eq.s32.totalorder %v3433_v56, 1 }
 0x3df   : > { %vm1297_vm11 = vcmp.eq.s32.totalorder %v3435_v57, 1  ;;  %v1314_v54 = vsel %vm1298_vm10, %v1218_v44, 0.0 }
 0x3e1   : > { %v3437_v58 = vpop.permute.xlu1 %1267 }
 0x3e2   : > { %v3439_v59 = vpop.permute.xlu0 %1264  ;;  %vm1300_vm14 = vcmp.eq.s32.totalorder %v3437_v58, 1 }
 0x3e3   : > { %vm1299_vm0 = vcmp.eq.s32.totalorder %v3439_v59, 1 }
 0x3e5   : > { %v1274_v60 = vpop.permute.xlu1 %1273 }
 0x3e6   : > { %v1271_v61 = vpop.permute.xlu0 %1270  ;;  %vm1302_vm4 = vcmp.eq.s32.totalorder %v1274_v60, 1  ;;  %v1313_v60 = vsel %vm1297_vm11, %v1217_v6, 0.0  ;;  %v1219_v6 = vmul.f32 %v3427_v34, %v3359_v19 }
 0x3e7   : > { %vm1301_vm5 = vcmp.eq.s32.totalorder %v1271_v61, 1  ;;  %v1318_v13 = vsel %vm1302_vm4, %v1222_v39, 0.0  ;;  %v1227_v39 = vmul.f32 %v3431_v48, %v3407_v55 }
 0x3e8   : > { %v1317_v47 = vsel %vm1301_vm5, %v1221_v4, 0.0 }
 0x3e9   : > { %v1280_v62 = vpop.permute.xlu1 %1279 }
 0x3ea   : > { %v1277_v63 = vpop.permute.xlu0 %1276  ;;  %vm1304_vm8 = vcmp.eq.s32.totalorder %v1280_v62, 1 }
 0x3eb   : > { %vm1303_vm9 = vcmp.eq.s32.totalorder %v1277_v63, 1  ;;  %v1320_v29 = vsel %vm1304_vm8, %v1224_v5, 0.0 }
 0x3ec   : > { %v1319_v35 = vsel %vm1303_vm9, %v1223_v8, 0.0 }
 0x3ed   : > { %v1286_v11 = vpop.permute.xlu1 %1285 }
 0x3ee   : > { %v1283_v18 = vpop.permute.xlu0 %1282  ;;  %vm1306_vm12 = vcmp.eq.s32.totalorder %v1286_v11, 1  ;;  %v1316_v11 = vsel %vm1300_vm14, %v3448_v7, 0.0 }
 0x3ef   : > { %v2038_v26 = vpop.f32.mrb[0].mxu0  ;;  %v2050_v27 = vpop.f32.mrb[0].mxu1  ;;  %vm1305_vm13 = vcmp.eq.s32.totalorder %v1283_v18, 1  ;;  %v1322_v62 = vsel %vm1306_vm12, %v1226_v9, 0.0 }
 0x3f0   : > { %v1465_v14 = vadd.f32 %v2038_v26, %v1310_v12  ;;  %v1505_v38 = vadd.f32 %v2050_v27, %v1318_v13  ;;  %v1459_v15 = vpop.f32.mrb[1].mxu0  ;;  %v1499_v49 = vpop.f32.mrb[1].mxu1  ;;  %v1321_v57 = vsel %vm1305_vm13, %v3456_v41, 0.0  ;;  %v1315_v12 = vsel %vm1299_vm0, %v1219_v6, 0.0 }
 0x3f1   : > { %v1460_v16 = vadd.f32 %v1459_v15, %v1309_v36  ;;  %v1500_v17 = vadd.f32 %v1499_v49, %v1317_v47  ;;  %v1292_v42 = vpop.permute.xlu1 %1291 }
 0x3f2   : > { %v1546_v21 = vadd.f32 %v3458_v10, %v1465_v14  ;;  %v1554_v22 = vadd.f32 %v3458_v10, %v1505_v38  ;;  %v1289_v50 = vpop.permute.xlu0 %1288  ;;  %vm1308_vm15 = vcmp.eq.s32.totalorder %v1292_v42, 1 }
 0x3f3   : > { %v1545_v24 = vadd.f32 %v3458_v10, %v1460_v16  ;;  %v1553_v25 = vadd.f32 %v3458_v10, %v1500_v17  ;;  %v2041_v28 = vpop.f32.mrb[2].mxu0  ;;  %vm1307_vm1 = vcmp.eq.s32.totalorder %v1289_v50, 1  ;;  %v1324_v8 = vsel %vm1308_vm15, %v1228_v40, 0.0 }
 0x3f4   : > { %1562 = vst [vmem:[%s3156_s0 + $0x8] sm:$0xff] %v1546_v21  ;;  %1570 = vst [vmem:[%s3156_s0 + $0x48] sm:$0xff] %v1554_v22  ;;  %v1475_v31 = vadd.f32 %v2041_v28, %v1312_v20  ;;  %v1469_v33 = vpop.f32.mrb[3].mxu0  ;;  %v1323_v18 = vsel %vm1307_vm1, %v1227_v39, 0.0 }
 0x3f5   : > { %v2053_v30 = vpop.f32.mrb[2].mxu1  ;;  %1561 = vst [vmem:[%s3156_s0] sm:$0xff] %v1545_v24  ;;  %1569 = vst [vmem:[%s3156_s0 + $0x40] sm:$0xff] %v1553_v25  ;;  %v1470_v43 = vadd.f32 %v1469_v33, %v1311_v23 }
 0x3f6   : > { %v1515_v32 = vadd.f32 %v2053_v30, %v1320_v29  ;;  %v1509_v37 = vpop.f32.mrb[3].mxu1  ;;  %v1548_v51 = vadd.f32 %v3458_v10, %v1475_v31 }
 0x3f7   : > { %v1510_v45 = vadd.f32 %v1509_v37, %v1319_v35  ;;  %v1547_v53 = vadd.f32 %v3458_v10, %v1470_v43 }
 0x3f8   : > { %v1556_v52 = vadd.f32 %v3458_v10, %v1515_v32  ;;  %1564 = vst [vmem:[%s3156_s0 + $0x18] sm:$0xff] %v1548_v51 }
 0x3f9   : > { %v1555_v46 = vadd.f32 %v3458_v10, %v1510_v45  ;;  %v2044_v61 = vpop.f32.mrb[4].mxu0  ;;  %1563 = vst [vmem:[%s3156_s0 + $0x10] sm:$0xff] %v1547_v53 }
 0x3fa   : > { %1572 = vst [vmem:[%s3156_s0 + $0x58] sm:$0xff] %v1556_v52  ;;  %v1485_v56 = vadd.f32 %v2044_v61, %v1314_v54  ;;  %v1479_v1 = vpop.f32.mrb[5].mxu0 }
 0x3fb   : > { %v2056_v63 = vpop.f32.mrb[4].mxu1  ;;  %1571 = vst [vmem:[%s3156_s0 + $0x50] sm:$0xff] %v1555_v46  ;;  %v1480_v3 = vadd.f32 %v1479_v1, %v1313_v60 }
 0x3fc   : > { %v1525_v0 = vadd.f32 %v2056_v63, %v1322_v62  ;;  %v1519_v2 = vpop.f32.mrb[5].mxu1  ;;  %v1550_v4 = vadd.f32 %v3458_v10, %v1485_v56 }
 0x3fd   : > { %v1520_v44 = vadd.f32 %v1519_v2, %v1321_v57  ;;  %v1549_v9 = vadd.f32 %v3458_v10, %v1480_v3 }
 0x3fe   : > { %v1558_v5 = vadd.f32 %v3458_v10, %v1525_v0  ;;  %1566 = vst [vmem:[%s3156_s0 + $0x28] sm:$0xff] %v1550_v4 }
 0x3ff   : > { %v1557_v41 = vadd.f32 %v3458_v10, %v1520_v44  ;;  %1565 = vst [vmem:[%s3156_s0 + $0x20] sm:$0xff] %v1549_v9 }
 0x400   : > { %1574 = vst [vmem:[%s3156_s0 + $0x68] sm:$0xff] %v1558_v5 }
 0x401   : > { %1573 = vst [vmem:[%s3156_s0 + $0x60] sm:$0xff] %v1557_v41 }
 0x403   : > { %v2047_v19 = vpop.f32.mrb[6].mxu0 }
 0x404   : > { %v1495_v55 = vadd.f32 %v2047_v19, %v1316_v11  ;;  %v1489_v26 = vpop.f32.mrb[7].mxu0 }
 0x405   : > { %v2059_v34 = vpop.f32.mrb[6].mxu1  ;;  %v1490_v58 = vadd.f32 %v1489_v26, %v1315_v12 }
 0x406   : > { %v1535_v48 = vadd.f32 %v2059_v34, %v1324_v8  ;;  %v1529_v13 = vpop.f32.mrb[7].mxu1  ;;  %v1552_v27 = vadd.f32 %v3458_v10, %v1495_v55 }
 0x407   : > { %v1530_v7 = vadd.f32 %v1529_v13, %v1323_v18  ;;  %v1551_v14 = vadd.f32 %v3458_v10, %v1490_v58 }
 0x408   : > { %v1560_v36 = vadd.f32 %v3458_v10, %v1535_v48  ;;  %1568 = vst [vmem:[%s3156_s0 + $0x38] sm:$0xff] %v1552_v27 }
 0x409   : > { %v1559_v38 = vadd.f32 %v3458_v10, %v1530_v7  ;;  %1567 = vst [vmem:[%s3156_s0 + $0x30] sm:$0xff] %v1551_v14 }
 0x40a   : > { %1576 = vst [vmem:[%s3156_s0 + $0x78] sm:$0xff] %v1560_v36 }
 0x40b   : > { %1575 = vst [vmem:[%s3156_s0 + $0x70] sm:$0xff] %v1559_v38 }
 0x40c PF: > { %s3698_s20 = sld [smem:[#allocation24_spill]]  ;;  %s3699_s14 = sld [smem:[#allocation35_spill]] }
 0x40d   : > { %s1591_s17 = sshll.u32 %s3156_s0, 4  ;;  %s3532_s16 = scalar_lea.sflag [#allocation5], %s353_s18  ;;  %s3528_s17 = int_to_ptr.vmem [resolvable:$true] %s1591_s17 }
 0x40e   : > { %s2511_s30 = scalar_lea.vmem %s3528_s17, 2048  ;;  %p3700_p2 = scmp.ne.s32.totalorder %s3678_s6, 0 }
 0x40f   : > { %p2512_p4 = scmp.ne.s32.totalorder %s3528_s17, %s2511_s30  ;;  %s2687_s27 = smov [#allocation14]  }
 0x410   : > { %s2515_s1 = sshll.u32 %s2687_s27, 4  ;;  %s2516_s1 = int_to_ptr.vmem [resolvable:$false] %s2515_s1 }
 0x411   : > { %p2513_p0 = pnand %p2512_p4, %p3700_p2  ;;  %s2517_s19 = scalar_lea.vmem %s2516_s1, 4096 }
 0x412   : > { %s1835_s13 = sshll.u32 %s3698_s20, 11  ;;  %p2518_p9 = scmp.lt.s32.totalorder %s3528_s17, %s2516_s1 }
 0x413   : > { %s3525_s7 = scalar_lea.hbm %s3699_s14, %s1835_s13  ;;  %p2514_p5 = pneg %p2513_p0 }
 0x414   : > { %p2519_p13 = scmp.lt.s32.totalorder %s2517_s19, %s2511_s30 }
 0x416   : > { %p2520_p12 = por %p2519_p13, %p2518_p9 }
 0x418   : > { %p2521_p1 = pnand %p2520_p12, %p2514_p5 }
 0x41a   : > { %2524 = shalt.err (!%p2521_p1)
}
 0x41b   : > { %s2525_s18 = scalar_lea.hbm %s3525_s7, 2048  ;;  %s2529_s11 = scalar_lea.hbm %s3699_s14, 8192 }
 0x41c   : > { %p2526_p10 = scmp.ne.s32.totalorder %s3525_s7, %s2525_s18  ;;  %p2530_p3 = scmp.lt.u32.totalorder %s3525_s7, %s3699_s14 }
 0x41d   : > { %p2531_p7 = scmp.lt.u32.totalorder %s2529_s11, %s2525_s18  ;;  %p2533_p4 = scmp.lt.u32.totalorder %s2525_s18, %s3525_s7 }
 0x41e   : > { %p2527_p6 = pnand %p2526_p10, %p3700_p2 }
 0x41f   : > { %p2532_p8 = por %p2531_p7, %p2530_p3 }
 0x420   : > { %p2528_p11 = pneg %p2527_p6 }
 0x421   : > { %p2534_p0 = por %p2533_p4, %p2532_p8 }
 0x423   : > { %p2535_p5 = pnand %p2534_p0, %p2528_p11 }
 0x425   : > { %2538 = shalt.err (!%p2535_p5)
}
 0x426   : > { %s2688_s3 = smov 128   ;;  %s2689_s24 = smov 8  }
 0x427   : > { %2146 = dma.vmem_to_hbm [thread:$0]  (%p3700_p2), %s3528_s17, 2048, %s3525_s7, %s3532_s16, %s2688_s3, %s2688_s3, %s2689_s24  }
 0x428 PF: > { %p2179_p9 = scmp.ge.s32.totalorder %s2673_s10, 2  ;;  %s1606_s30 = sand.u32 1, %s2621_s21  }
 0x429   : > { %p3701_p13 = scmp.ne.s32.totalorder %s3681_s25, 0  ;;  %s1607_s27 = scalar_lea.sflag [#allocation5], %s1606_s30 }
 0x42b   : > { %p2169_p12 = pnand %p2179_p9, %p3701_p13 }
 0x42d   : > { %2616 = dma.done.wait (!%p2169_p12), %s1607_s27, 2048  }
 0x42e   : > { %2618 = vsyncadd (!%p2169_p12), %s1607_s27, 4294965248  ;;  %s27_s10 = sadd.s32 1, %s2673_s10   ;;  %s3703_s24 = sld [smem:[#allocation21_spill]] }
 0x42f   : > { %p3561_p1 = scmp.ge.s32.totalorder %s27_s10, 10   ;;  %s3704_s25 = sld [smem:[#allocation22_spill]] }
 0x430   : > { %s3705_s26 = sld [smem:[#allocation28_spill]]  ;;  %s3706_s6 = sld [smem:[#allocation26_spill]] }
 0x431   : > { %s3707_s17 = sld [smem:[#allocation27_spill]]  ;;  %s3708_s21 = smov %s2625_s22 }
 0x432   : > { %s3709_s22 = smov %s2629_s23  ;;  %s3710_s23 = smov %s3050_s2 }
 0x433   : > { %s3711_s27 = smov %s2649_s28  ;;  %s3712_s28 = smov %s2653_s29 }
 0x434   : > { %s3713_s29 = smov %s2979_s15  ;;  %s3714_s30 = smov %s2665_s8 }
 0x435   : > { %s3715_s7 = smov %s2669_s9  ;;  %26 = sbr.rel (!%p3561_p1) target bundleno = 20 (0x14), region = 133 }
 0x436   : > { %s3716_s8 = smov %s3706_s6 }
 0x437   : > { %s3717_s9 = smov %s3707_s17 }
 0x43c   :  { %1612 = vsyncpa [#allocation4], 1 }
 0x43d   :  { %1614 = vsyncpa [#allocation4 + $0x1], 1 }
 0x43e   :  { %1615 = vsyncpa [#allocation7], 1 }
 0x43f   :  { %1617 = vsyncpa [#allocation7 + $0x1], 1 }
 0x440   :  { %1618 = vsyncpa [#allocation10], 1 }
 0x441   :  { %1619 = vsyncpa [#allocation13], 1 }
 0x442   :  { %1620 = vsyncpa [#allocation5], 1 }
 0x443   :  { %1622 = vsyncpa [#allocation5 + $0x1], 1 }

</bundles_post_ra>
